<compile_context>
chip_gen: v6e
topology: v6e:2x2x1
jax: 0.10.0
libtpu: 0.0.40
codegen_flags: <defaults>
</compile_context>

<pallas_src>
import math
import functools

import jax
import jax.numpy as jnp
from jax import lax
from jax.experimental import pallas as pl
from jax.experimental.pallas import tpu as pltpu


# ----------------------------------------------------------------------------
# small math helpers (f32)
# ----------------------------------------------------------------------------
def _gelu(x):
    return 0.5 * x * (1.0 + jnp.tanh(math.sqrt(2.0 / math.pi) *
                                     (x + 0.044715 * x * x * x)))


def _layernorm(z, g, b, eps=1e-5):
    u = jnp.mean(z, axis=-1, keepdims=True)
    zc = z - u
    s = jnp.mean(zc * zc, axis=-1, keepdims=True)
    return zc * lax.rsqrt(s + eps) * g + b


def _full_spec(arr):
    """BlockSpec covering the whole (small, resident) weight array.

    Constant index map -> the Pallas pipeliner does not re-DMA it across
    grid steps."""
    nd = arr.ndim
    return pl.BlockSpec(arr.shape, lambda b, _nd=nd: (0,) * _nd)


def _vmem_limit_bytes(T, D, H):
    """Rough residency estimate (bytes), clamped to be safe on v5e/v6e/v7x."""
    weights = 2 * (3 * D * D + D * D + 4 * D * D + 4 * D * D) * 2  # bf16, 2 bufs
    biases = 4 * (3 * D + 9 * D) * 2
    acts = 4 * (3 * T * D + 2 * T * T + 5 * T * D + 4 * T * D)     # f32 temps
    io = 2 * 2 * (2 * T * D)                                       # bf16 in/out
    est = weights + biases + acts + io + (4 << 20)
    return int(min(max(est, 16 << 20), 48 << 20))


# ----------------------------------------------------------------------------
# Fused transformer-Block kernel (one grid step per batch element)
# ----------------------------------------------------------------------------
def _block_kernel(x_ref, w_attn_ref, b_attn_ref, w_ap_ref, b_ap_ref,
                  g1_ref, b1_ref, w_fc_ref, b_fc_ref, w_mp_ref, b_mp_ref,
                  g2_ref, b2_ref, o_ref, *, n_head, scale):
    _, T, D = x_ref.shape
    H = n_head
    hd = D // H

    x = x_ref[0]                               # (T, D) f32 or bf16
    x_f32 = x.astype(jnp.float32)
    x_bf = x.astype(jnp.bfloat16)

    # ---- c_attn: fused qkv projection (full 3D-wide MXU matmul) ----
    qkv = jnp.dot(x_bf, w_attn_ref[...],
                  preferred_element_type=jnp.float32) + b_attn_ref[...]  # (T, 3D)

    # causal mask, hoisted out of the per-head loop
    row = lax.broadcasted_iota(jnp.int32, (T, T), 0)
    col = lax.broadcasted_iota(jnp.int32, (T, T), 1)
    causal = col <= row

    # ---- per-head causal attention with fused merge_heads + c_proj ----
    # c_proj(concat_h a_h) == sum_h a_h @ W_proj[h*hd:(h+1)*hd, :]
    w_ap = w_ap_ref[...]                        # (D, D) bf16, resident
    acc = jnp.zeros((T, D), jnp.float32)
    for h in range(H):                          # static unrolled head loop
        lo = h * hd
        q_h = qkv[:, lo:lo + hd].astype(jnp.bfloat16)               # (T, hd)
        k_h = qkv[:, D + lo:D + lo + hd].astype(jnp.bfloat16)
        v_h = qkv[:, 2 * D + lo:2 * D + lo + hd].astype(jnp.bfloat16)

        s = jnp.dot(q_h, k_h.T, preferred_element_type=jnp.float32) * scale
        s = jnp.where(causal, s, jnp.float32(-1e9))                 # (T, T) f32
        s = s - jnp.max(s, axis=-1, keepdims=True)
        p = jnp.exp(s)
        p = p * pl.reciprocal(jnp.sum(p, axis=-1, keepdims=True))   # exact
        # TODO(synk): attn_dropout treated as identity (eval mode).

        a_h = jnp.dot(p.astype(jnp.bfloat16), v_h,
                      preferred_element_type=jnp.float32)           # (T, hd)
        acc = acc + jnp.dot(a_h.astype(jnp.bfloat16), w_ap[lo:lo + hd, :],
                            preferred_element_type=jnp.float32)

    a = acc + b_ap_ref[...]
    # TODO(synk): resid_dropout treated as identity (eval mode).

    n = _layernorm(x_f32 + a, g1_ref[...], b1_ref[...])             # (T, D) f32

    # ---- MLP ----
    t = jnp.dot(n.astype(jnp.bfloat16), w_fc_ref[...],
                preferred_element_type=jnp.float32) + b_fc_ref[...]  # (T, 4D)
    m = jnp.dot(_gelu(t).astype(jnp.bfloat16), w_mp_ref[...],
                preferred_element_type=jnp.float32) + b_mp_ref[...]  # (T, D)
    # TODO(synk): mlp dropout treated as identity (eval mode).

    o_ref[0] = _layernorm(n + m, g2_ref[...], b2_ref[...]).astype(o_ref.dtype)


def transformer_block(h, params, n_head):
    B, T, D = h.shape
    hd = D // n_head
    (w_attn, b_attn, w_aproj, b_aproj, ln1_g, ln1_b,
     w_fc, b_fc, w_mproj, b_mproj, ln2_g, ln2_b) = params

    # bf16 MXU operands (f32 accumulation in-kernel); biases / LN params f32.
    wts = (w_attn.astype(jnp.bfloat16), b_attn,
           w_aproj.astype(jnp.bfloat16), b_aproj, ln1_g, ln1_b,
           w_fc.astype(jnp.bfloat16), b_fc,
           w_mproj.astype(jnp.bfloat16), b_mproj, ln2_g, ln2_b)

    kernel = functools.partial(_block_kernel, n_head=n_head,
                               scale=1.0 / math.sqrt(hd))

    io_spec = pl.BlockSpec((1, T, D), lambda b: (b, 0, 0))
    in_specs = [io_spec] + [_full_spec(w) for w in wts]

    flops = B * (2 * T * D * 3 * D          # qkv
                 + 4 * T * T * D            # scores + PV
                 + 2 * T * D * D            # c_proj
                 + 16 * T * D * D)          # MLP
    transc = B * (n_head * T * T + T * 4 * D)
    bytes_acc = B * (2 * 2 * T * D) + 12 * D * D * 2 + 16 * D * 4

    return pl.pallas_call(
        kernel,
        out_shape=jax.ShapeDtypeStruct((B, T, D), jnp.bfloat16),
        grid=(B,),
        in_specs=in_specs,
        out_specs=pl.BlockSpec((1, T, D), lambda b: (b, 0, 0)),
        compiler_params=pltpu.CompilerParams(
            dimension_semantics=("parallel",),
            vmem_limit_bytes=_vmem_limit_bytes(T, D, n_head)),
        cost_estimate=pl.CostEstimate(
            flops=int(flops), transcendentals=int(transc),
            bytes_accessed=int(bytes_acc)),
    )(h, *wts)


@functools.partial(jax.jit, static_argnums=(3,))
def model_forward(tokens, emb_w, block_params, n_head):
    # x.view(-1, T, S); e = embed(x); h = e.sum(dim=2)  (plain-JAX glue)
    x = tokens.reshape(-1, tokens.shape[-2], tokens.shape[-1])
    e = jnp.take(emb_w, x, axis=0)            # (B, T, S, D)
    h = e.sum(axis=2)                         # (B, T, D) f32
    # TODO(synk): embd dropout treated as identity (eval mode).
    for params in block_params:
        h = transformer_block(h, params, n_head)   # bf16 between blocks
    return h.astype(jnp.float32)


# ----------------------------------------------------------------------------
# Parameter init + pure-JAX reference (for sanity check)
# ----------------------------------------------------------------------------
def init_params(key, n_embd, n_layer, vocab):
    keys = jax.random.split(key, 1 + n_layer)
    emb_w = 0.02 * jax.random.normal(keys[0], (vocab, n_embd), jnp.float32)
    blocks = []
    D = n_embd
    for l in range(n_layer):
        k = jax.random.split(keys[1 + l], 4)
        w_attn = 0.02 * jax.random.normal(k[0], (D, 3 * D), jnp.float32)
        b_attn = jnp.zeros((1, 3 * D), jnp.float32)
        w_aproj = 0.02 * jax.random.normal(k[1], (D, D), jnp.float32)
        b_aproj = jnp.zeros((1, D), jnp.float32)
        ln1_g = jnp.ones((1, D), jnp.float32)
        ln1_b = jnp.zeros((1, D), jnp.float32)
        w_fc = 0.02 * jax.random.normal(k[2], (D, 4 * D), jnp.float32)
        b_fc = jnp.zeros((1, 4 * D), jnp.float32)
        w_mproj = 0.02 * jax.random.normal(k[3], (4 * D, D), jnp.float32)
        b_mproj = jnp.zeros((1, D), jnp.float32)
        ln2_g = jnp.ones((1, D), jnp.float32)
        ln2_b = jnp.zeros((1, D), jnp.float32)
        blocks.append((w_attn, b_attn, w_aproj, b_aproj, ln1_g, ln1_b,
                       w_fc, b_fc, w_mproj, b_mproj, ln2_g, ln2_b))
    return emb_w, blocks


def reference_forward(tokens, emb_w, block_params, n_head):
    """Pure-JAX f32 reference mirroring the PyTorch semantics."""
    x = tokens.reshape(-1, tokens.shape[-2], tokens.shape[-1])
    e = jnp.take(emb_w, x, axis=0)
    h = e.sum(axis=2)
    B, T, D = h.shape
    hd = D // n_head
    mask = jnp.tril(jnp.ones((T, T), jnp.float32))
    for (w_attn, b_attn, w_aproj, b_aproj, ln1_g, ln1_b,
         w_fc, b_fc, w_mproj, b_mproj, ln2_g, ln2_b) in block_params:
        qkv = h @ w_attn + b_attn
        q, k, v = jnp.split(qkv, 3, axis=-1)
        q = q.reshape(B, T, n_head, hd).transpose(0, 2, 1, 3)
        k = k.reshape(B, T, n_head, hd).transpose(0, 2, 1, 3)
        v = v.reshape(B, T, n_head, hd).transpose(0, 2, 1, 3)
        s = jnp.einsum('bhtd,bhsd->bhts', q, k) / math.sqrt(hd)
        s = s * mask + (-1e9) * (1.0 - mask)
        p = jax.nn.softmax(s, axis=-1)
        a = jnp.einsum('bhts,bhsd->bhtd', p, v)
        a = a.transpose(0, 2, 1, 3).reshape(B, T, D)
        a = a @ w_aproj + b_aproj
        n = _layernorm(h + a, ln1_g, ln1_b)
        t = n @ w_fc + b_fc
        m = _gelu(t) @ w_mproj + b_mproj
        h = _layernorm(n + m, ln2_g, ln2_b)
    return h


if __name__ == "__main__":
    # small config: n_embd=32, n_head=4, n_layer=2, seq=8, 2 sub-tokens, vocab=128
    B, T, S = 2, 8, 2
    n_embd, n_head, n_layer, vocab = 32, 4, 2, 128

    key = jax.random.PRNGKey(0)
    kp, kt = jax.random.split(key)
    emb_w, blocks = init_params(kp, n_embd, n_layer, vocab)
    tokens = jax.random.randint(kt, (B, T, S), 0, vocab, dtype=jnp.int32)

    out = jax.block_until_ready(model_forward(tokens, emb_w, blocks, n_head))

    ref = reference_forward(tokens, emb_w, blocks, n_head)
    assert out.shape == (B, T, n_embd)
    # bf16 MXU operands + bf16 inter-block activations vs f32 reference
    assert bool(jnp.allclose(out, ref, atol=3e-2, rtol=3e-2))

    print("KERNEL_OK")
</pallas_src>

<mosaic_0001>
module attributes {stable_mosaic.version = 11 : i64} {
  func.func @_block_kernel(%arg0: i32, %arg1: memref<1x8x32xf32, #tpu.memory_space<vmem>>, %arg2: memref<32x96xbf16, #tpu.memory_space<vmem>>, %arg3: memref<1x96xf32, #tpu.memory_space<vmem>>, %arg4: memref<32x32xbf16, #tpu.memory_space<vmem>>, %arg5: memref<1x32xf32, #tpu.memory_space<vmem>>, %arg6: memref<1x32xf32, #tpu.memory_space<vmem>>, %arg7: memref<1x32xf32, #tpu.memory_space<vmem>>, %arg8: memref<32x128xbf16, #tpu.memory_space<vmem>>, %arg9: memref<1x128xf32, #tpu.memory_space<vmem>>, %arg10: memref<128x32xbf16, #tpu.memory_space<vmem>>, %arg11: memref<1x32xf32, #tpu.memory_space<vmem>>, %arg12: memref<1x32xf32, #tpu.memory_space<vmem>>, %arg13: memref<1x32xf32, #tpu.memory_space<vmem>>, %arg14: memref<1x8x32xbf16, #tpu.memory_space<vmem>>) attributes {dimension_semantics = [#tpu.dimension_semantics<parallel>], iteration_bounds = array<i64: 2>, scalar_prefetch = 0 : i64, scratch_operands = 0 : i64, tpu.core_type = #tpu.core_type<tc>, window_params = [{transform_indices = @transform_0, window_bounds = array<i64: 1, 8, 32>}, {pipeline_mode = #tpu.pipeline_mode<synchronous>, transform_indices = @transform_1, window_bounds = array<i64: 32, 96>}, {pipeline_mode = #tpu.pipeline_mode<synchronous>, transform_indices = @transform_2, window_bounds = array<i64: 1, 96>}, {pipeline_mode = #tpu.pipeline_mode<synchronous>, transform_indices = @transform_3, window_bounds = array<i64: 32, 32>}, {pipeline_mode = #tpu.pipeline_mode<synchronous>, transform_indices = @transform_4, window_bounds = array<i64: 1, 32>}, {pipeline_mode = #tpu.pipeline_mode<synchronous>, transform_indices = @transform_5, window_bounds = array<i64: 1, 32>}, {pipeline_mode = #tpu.pipeline_mode<synchronous>, transform_indices = @transform_6, window_bounds = array<i64: 1, 32>}, {pipeline_mode = #tpu.pipeline_mode<synchronous>, transform_indices = @transform_7, window_bounds = array<i64: 32, 128>}, {pipeline_mode = #tpu.pipeline_mode<synchronous>, transform_indices = @transform_8, window_bounds = array<i64: 1, 128>}, {pipeline_mode = #tpu.pipeline_mode<synchronous>, transform_indices = @transform_9, window_bounds = array<i64: 128, 32>}, {pipeline_mode = #tpu.pipeline_mode<synchronous>, transform_indices = @transform_10, window_bounds = array<i64: 1, 32>}, {pipeline_mode = #tpu.pipeline_mode<synchronous>, transform_indices = @transform_11, window_bounds = array<i64: 1, 32>}, {pipeline_mode = #tpu.pipeline_mode<synchronous>, transform_indices = @transform_12, window_bounds = array<i64: 1, 32>}, {transform_indices = @transform_13, window_bounds = array<i64: 1, 8, 32>}]} {
    %c0 = arith.constant 0 : index
    %c0_0 = arith.constant 0 : index
    %c0_1 = arith.constant 0 : index
    %0 = vector.load %arg1[%c0, %c0_0, %c0_1] : memref<1x8x32xf32, #tpu.memory_space<vmem>>, vector<1x8x32xf32>
    %1 = vector.shape_cast %0 : vector<1x8x32xf32> to vector<8x32xf32>
    %2 = arith.truncf %1 : vector<8x32xf32> to vector<8x32xbf16>
    %c0_2 = arith.constant 0 : index
    %c0_3 = arith.constant 0 : index
    %3 = vector.load %arg2[%c0_2, %c0_3] : memref<32x96xbf16, #tpu.memory_space<vmem>>, vector<32x96xbf16>
    %cst = arith.constant dense<0.000000e+00> : vector<8x96xf32>
    %4 = tpu.matmul %2, %3, %cst {dimension_numbers = #tpu.dot_dimension_numbers<[1], [0], [0], [1], [0, 0, 1, 1], [], []>} : vector<8x32xbf16>, vector<32x96xbf16>, vector<8x96xf32> -> vector<8x96xf32>
    %c0_4 = arith.constant 0 : index
    %c0_5 = arith.constant 0 : index
    %5 = vector.load %arg3[%c0_4, %c0_5] : memref<1x96xf32, #tpu.memory_space<vmem>>, vector<1x96xf32>
    %6 = vector.broadcast %5 : vector<1x96xf32> to vector<8x96xf32>
    %7 = arith.addf %4, %6 : vector<8x96xf32>
    %8 = tpu.iota {dimensions = array<i32: 0>} : vector<8x8xi32>
    %9 = tpu.iota {dimensions = array<i32: 1>} : vector<8x8xi32>
    %10 = arith.cmpi sle, %9, %8 : vector<8x8xi32>
    %c0_6 = arith.constant 0 : index
    %c0_7 = arith.constant 0 : index
    %11 = vector.load %arg4[%c0_6, %c0_7] : memref<32x32xbf16, #tpu.memory_space<vmem>>, vector<32x32xbf16>
    %cst_8 = arith.constant 0.000000e+00 : f32
    %12 = vector.broadcast %cst_8 : f32 to vector<8x32xf32>
    %13 = vector.extract_strided_slice %7 {offsets = [0, 0], sizes = [8, 8], strides = [1, 1]} : vector<8x96xf32> to vector<8x8xf32>
    %14 = arith.truncf %13 : vector<8x8xf32> to vector<8x8xbf16>
    %15 = vector.extract_strided_slice %7 {offsets = [0, 32], sizes = [8, 8], strides = [1, 1]} : vector<8x96xf32> to vector<8x8xf32>
    %16 = arith.truncf %15 : vector<8x8xf32> to vector<8x8xbf16>
    %17 = vector.extract_strided_slice %7 {offsets = [0, 64], sizes = [8, 8], strides = [1, 1]} : vector<8x96xf32> to vector<8x8xf32>
    %18 = arith.truncf %17 : vector<8x8xf32> to vector<8x8xbf16>
    %19 = tpu.transpose %16, [1, 0] : vector<8x8xbf16> -> vector<8x8xbf16>
    %cst_9 = arith.constant dense<0.000000e+00> : vector<8x8xf32>
    %20 = tpu.matmul %14, %19, %cst_9 {dimension_numbers = #tpu.dot_dimension_numbers<[1], [0], [0], [1], [0, 0, 1, 1], [], []>} : vector<8x8xbf16>, vector<8x8xbf16>, vector<8x8xf32> -> vector<8x8xf32>
    %cst_10 = arith.constant 0.353553385 : f32
    %21 = vector.broadcast %cst_10 : f32 to vector<8x8xf32>
    %22 = arith.mulf %20, %21 : vector<8x8xf32>
    %cst_11 = arith.constant -1.000000e+09 : f32
    %23 = vector.broadcast %cst_11 : f32 to vector<8x8xf32>
    %24 = arith.select %10, %22, %23 : vector<8x8xi1>, vector<8x8xf32>
    %cst_12 = arith.constant dense<0xFF800000> : vector<8xf32>
    %25 = vector.multi_reduction <maximumf>, %24, %cst_12 [1] : vector<8x8xf32> to vector<8xf32>
    %26 = vector.shape_cast %25 : vector<8xf32> to vector<8x1xf32>
    %27 = vector.broadcast %26 : vector<8x1xf32> to vector<8x8xf32>
    %28 = arith.subf %24, %27 : vector<8x8xf32>
    %29 = math.exp %28 : vector<8x8xf32>
    %cst_13 = arith.constant dense<0.000000e+00> : vector<8xf32>
    %30 = vector.multi_reduction <add>, %29, %cst_13 [1] : vector<8x8xf32> to vector<8xf32>
    %31 = vector.shape_cast %30 : vector<8xf32> to vector<8x1xf32>
    %32 = tpu.reciprocal %31 : vector<8x1xf32> -> vector<8x1xf32>
    %33 = vector.broadcast %32 : vector<8x1xf32> to vector<8x8xf32>
    %34 = arith.mulf %29, %33 : vector<8x8xf32>
    %35 = arith.truncf %34 : vector<8x8xf32> to vector<8x8xbf16>
    %cst_14 = arith.constant dense<0.000000e+00> : vector<8x8xf32>
    %36 = tpu.matmul %35, %18, %cst_14 {dimension_numbers = #tpu.dot_dimension_numbers<[1], [0], [0], [1], [0, 0, 1, 1], [], []>} : vector<8x8xbf16>, vector<8x8xbf16>, vector<8x8xf32> -> vector<8x8xf32>
    %37 = arith.truncf %36 : vector<8x8xf32> to vector<8x8xbf16>
    %38 = vector.extract_strided_slice %11 {offsets = [0, 0], sizes = [8, 32], strides = [1, 1]} : vector<32x32xbf16> to vector<8x32xbf16>
    %cst_15 = arith.constant dense<0.000000e+00> : vector<8x32xf32>
    %39 = tpu.matmul %37, %38, %cst_15 {dimension_numbers = #tpu.dot_dimension_numbers<[1], [0], [0], [1], [0, 0, 1, 1], [], []>} : vector<8x8xbf16>, vector<8x32xbf16>, vector<8x32xf32> -> vector<8x32xf32>
    %40 = arith.addf %12, %39 : vector<8x32xf32>
    %41 = vector.extract_strided_slice %7 {offsets = [0, 8], sizes = [8, 8], strides = [1, 1]} : vector<8x96xf32> to vector<8x8xf32>
    %42 = arith.truncf %41 : vector<8x8xf32> to vector<8x8xbf16>
    %43 = vector.extract_strided_slice %7 {offsets = [0, 40], sizes = [8, 8], strides = [1, 1]} : vector<8x96xf32> to vector<8x8xf32>
    %44 = arith.truncf %43 : vector<8x8xf32> to vector<8x8xbf16>
    %45 = vector.extract_strided_slice %7 {offsets = [0, 72], sizes = [8, 8], strides = [1, 1]} : vector<8x96xf32> to vector<8x8xf32>
    %46 = arith.truncf %45 : vector<8x8xf32> to vector<8x8xbf16>
    %47 = tpu.transpose %44, [1, 0] : vector<8x8xbf16> -> vector<8x8xbf16>
    %cst_16 = arith.constant dense<0.000000e+00> : vector<8x8xf32>
    %48 = tpu.matmul %42, %47, %cst_16 {dimension_numbers = #tpu.dot_dimension_numbers<[1], [0], [0], [1], [0, 0, 1, 1], [], []>} : vector<8x8xbf16>, vector<8x8xbf16>, vector<8x8xf32> -> vector<8x8xf32>
    %cst_17 = arith.constant 0.353553385 : f32
    %49 = vector.broadcast %cst_17 : f32 to vector<8x8xf32>
    %50 = arith.mulf %48, %49 : vector<8x8xf32>
    %cst_18 = arith.constant -1.000000e+09 : f32
    %51 = vector.broadcast %cst_18 : f32 to vector<8x8xf32>
    %52 = arith.select %10, %50, %51 : vector<8x8xi1>, vector<8x8xf32>
    %cst_19 = arith.constant dense<0xFF800000> : vector<8xf32>
    %53 = vector.multi_reduction <maximumf>, %52, %cst_19 [1] : vector<8x8xf32> to vector<8xf32>
    %54 = vector.shape_cast %53 : vector<8xf32> to vector<8x1xf32>
    %55 = vector.broadcast %54 : vector<8x1xf32> to vector<8x8xf32>
    %56 = arith.subf %52, %55 : vector<8x8xf32>
    %57 = math.exp %56 : vector<8x8xf32>
    %cst_20 = arith.constant dense<0.000000e+00> : vector<8xf32>
    %58 = vector.multi_reduction <add>, %57, %cst_20 [1] : vector<8x8xf32> to vector<8xf32>
    %59 = vector.shape_cast %58 : vector<8xf32> to vector<8x1xf32>
    %60 = tpu.reciprocal %59 : vector<8x1xf32> -> vector<8x1xf32>
    %61 = vector.broadcast %60 : vector<8x1xf32> to vector<8x8xf32>
    %62 = arith.mulf %57, %61 : vector<8x8xf32>
    %63 = arith.truncf %62 : vector<8x8xf32> to vector<8x8xbf16>
    %cst_21 = arith.constant dense<0.000000e+00> : vector<8x8xf32>
    %64 = tpu.matmul %63, %46, %cst_21 {dimension_numbers = #tpu.dot_dimension_numbers<[1], [0], [0], [1], [0, 0, 1, 1], [], []>} : vector<8x8xbf16>, vector<8x8xbf16>, vector<8x8xf32> -> vector<8x8xf32>
    %65 = arith.truncf %64 : vector<8x8xf32> to vector<8x8xbf16>
    %66 = vector.extract_strided_slice %11 {offsets = [8, 0], sizes = [8, 32], strides = [1, 1]} : vector<32x32xbf16> to vector<8x32xbf16>
    %cst_22 = arith.constant dense<0.000000e+00> : vector<8x32xf32>
    %67 = tpu.matmul %65, %66, %cst_22 {dimension_numbers = #tpu.dot_dimension_numbers<[1], [0], [0], [1], [0, 0, 1, 1], [], []>} : vector<8x8xbf16>, vector<8x32xbf16>, vector<8x32xf32> -> vector<8x32xf32>
    %68 = arith.addf %40, %67 : vector<8x32xf32>
    %69 = vector.extract_strided_slice %7 {offsets = [0, 16], sizes = [8, 8], strides = [1, 1]} : vector<8x96xf32> to vector<8x8xf32>
    %70 = arith.truncf %69 : vector<8x8xf32> to vector<8x8xbf16>
    %71 = vector.extract_strided_slice %7 {offsets = [0, 48], sizes = [8, 8], strides = [1, 1]} : vector<8x96xf32> to vector<8x8xf32>
    %72 = arith.truncf %71 : vector<8x8xf32> to vector<8x8xbf16>
    %73 = vector.extract_strided_slice %7 {offsets = [0, 80], sizes = [8, 8], strides = [1, 1]} : vector<8x96xf32> to vector<8x8xf32>
    %74 = arith.truncf %73 : vector<8x8xf32> to vector<8x8xbf16>
    %75 = tpu.transpose %72, [1, 0] : vector<8x8xbf16> -> vector<8x8xbf16>
    %cst_23 = arith.constant dense<0.000000e+00> : vector<8x8xf32>
    %76 = tpu.matmul %70, %75, %cst_23 {dimension_numbers = #tpu.dot_dimension_numbers<[1], [0], [0], [1], [0, 0, 1, 1], [], []>} : vector<8x8xbf16>, vector<8x8xbf16>, vector<8x8xf32> -> vector<8x8xf32>
    %cst_24 = arith.constant 0.353553385 : f32
    %77 = vector.broadcast %cst_24 : f32 to vector<8x8xf32>
    %78 = arith.mulf %76, %77 : vector<8x8xf32>
    %cst_25 = arith.constant -1.000000e+09 : f32
    %79 = vector.broadcast %cst_25 : f32 to vector<8x8xf32>
    %80 = arith.select %10, %78, %79 : vector<8x8xi1>, vector<8x8xf32>
    %cst_26 = arith.constant dense<0xFF800000> : vector<8xf32>
    %81 = vector.multi_reduction <maximumf>, %80, %cst_26 [1] : vector<8x8xf32> to vector<8xf32>
    %82 = vector.shape_cast %81 : vector<8xf32> to vector<8x1xf32>
    %83 = vector.broadcast %82 : vector<8x1xf32> to vector<8x8xf32>
    %84 = arith.subf %80, %83 : vector<8x8xf32>
    %85 = math.exp %84 : vector<8x8xf32>
    %cst_27 = arith.constant dense<0.000000e+00> : vector<8xf32>
    %86 = vector.multi_reduction <add>, %85, %cst_27 [1] : vector<8x8xf32> to vector<8xf32>
    %87 = vector.shape_cast %86 : vector<8xf32> to vector<8x1xf32>
    %88 = tpu.reciprocal %87 : vector<8x1xf32> -> vector<8x1xf32>
    %89 = vector.broadcast %88 : vector<8x1xf32> to vector<8x8xf32>
    %90 = arith.mulf %85, %89 : vector<8x8xf32>
    %91 = arith.truncf %90 : vector<8x8xf32> to vector<8x8xbf16>
    %cst_28 = arith.constant dense<0.000000e+00> : vector<8x8xf32>
    %92 = tpu.matmul %91, %74, %cst_28 {dimension_numbers = #tpu.dot_dimension_numbers<[1], [0], [0], [1], [0, 0, 1, 1], [], []>} : vector<8x8xbf16>, vector<8x8xbf16>, vector<8x8xf32> -> vector<8x8xf32>
    %93 = arith.truncf %92 : vector<8x8xf32> to vector<8x8xbf16>
    %94 = vector.extract_strided_slice %11 {offsets = [16, 0], sizes = [8, 32], strides = [1, 1]} : vector<32x32xbf16> to vector<8x32xbf16>
    %cst_29 = arith.constant dense<0.000000e+00> : vector<8x32xf32>
    %95 = tpu.matmul %93, %94, %cst_29 {dimension_numbers = #tpu.dot_dimension_numbers<[1], [0], [0], [1], [0, 0, 1, 1], [], []>} : vector<8x8xbf16>, vector<8x32xbf16>, vector<8x32xf32> -> vector<8x32xf32>
    %96 = arith.addf %68, %95 : vector<8x32xf32>
    %97 = vector.extract_strided_slice %7 {offsets = [0, 24], sizes = [8, 8], strides = [1, 1]} : vector<8x96xf32> to vector<8x8xf32>
    %98 = arith.truncf %97 : vector<8x8xf32> to vector<8x8xbf16>
    %99 = vector.extract_strided_slice %7 {offsets = [0, 56], sizes = [8, 8], strides = [1, 1]} : vector<8x96xf32> to vector<8x8xf32>
    %100 = arith.truncf %99 : vector<8x8xf32> to vector<8x8xbf16>
    %101 = vector.extract_strided_slice %7 {offsets = [0, 88], sizes = [8, 8], strides = [1, 1]} : vector<8x96xf32> to vector<8x8xf32>
    %102 = arith.truncf %101 : vector<8x8xf32> to vector<8x8xbf16>
    %103 = tpu.transpose %100, [1, 0] : vector<8x8xbf16> -> vector<8x8xbf16>
    %cst_30 = arith.constant dense<0.000000e+00> : vector<8x8xf32>
    %104 = tpu.matmul %98, %103, %cst_30 {dimension_numbers = #tpu.dot_dimension_numbers<[1], [0], [0], [1], [0, 0, 1, 1], [], []>} : vector<8x8xbf16>, vector<8x8xbf16>, vector<8x8xf32> -> vector<8x8xf32>
    %cst_31 = arith.constant 0.353553385 : f32
    %105 = vector.broadcast %cst_31 : f32 to vector<8x8xf32>
    %106 = arith.mulf %104, %105 : vector<8x8xf32>
    %cst_32 = arith.constant -1.000000e+09 : f32
    %107 = vector.broadcast %cst_32 : f32 to vector<8x8xf32>
    %108 = arith.select %10, %106, %107 : vector<8x8xi1>, vector<8x8xf32>
    %cst_33 = arith.constant dense<0xFF800000> : vector<8xf32>
    %109 = vector.multi_reduction <maximumf>, %108, %cst_33 [1] : vector<8x8xf32> to vector<8xf32>
    %110 = vector.shape_cast %109 : vector<8xf32> to vector<8x1xf32>
    %111 = vector.broadcast %110 : vector<8x1xf32> to vector<8x8xf32>
    %112 = arith.subf %108, %111 : vector<8x8xf32>
    %113 = math.exp %112 : vector<8x8xf32>
    %cst_34 = arith.constant dense<0.000000e+00> : vector<8xf32>
    %114 = vector.multi_reduction <add>, %113, %cst_34 [1] : vector<8x8xf32> to vector<8xf32>
    %115 = vector.shape_cast %114 : vector<8xf32> to vector<8x1xf32>
    %116 = tpu.reciprocal %115 : vector<8x1xf32> -> vector<8x1xf32>
    %117 = vector.broadcast %116 : vector<8x1xf32> to vector<8x8xf32>
    %118 = arith.mulf %113, %117 : vector<8x8xf32>
    %119 = arith.truncf %118 : vector<8x8xf32> to vector<8x8xbf16>
    %cst_35 = arith.constant dense<0.000000e+00> : vector<8x8xf32>
    %120 = tpu.matmul %119, %102, %cst_35 {dimension_numbers = #tpu.dot_dimension_numbers<[1], [0], [0], [1], [0, 0, 1, 1], [], []>} : vector<8x8xbf16>, vector<8x8xbf16>, vector<8x8xf32> -> vector<8x8xf32>
    %121 = arith.truncf %120 : vector<8x8xf32> to vector<8x8xbf16>
    %122 = vector.extract_strided_slice %11 {offsets = [24, 0], sizes = [8, 32], strides = [1, 1]} : vector<32x32xbf16> to vector<8x32xbf16>
    %cst_36 = arith.constant dense<0.000000e+00> : vector<8x32xf32>
    %123 = tpu.matmul %121, %122, %cst_36 {dimension_numbers = #tpu.dot_dimension_numbers<[1], [0], [0], [1], [0, 0, 1, 1], [], []>} : vector<8x8xbf16>, vector<8x32xbf16>, vector<8x32xf32> -> vector<8x32xf32>
    %124 = arith.addf %96, %123 : vector<8x32xf32>
    %c0_37 = arith.constant 0 : index
    %c0_38 = arith.constant 0 : index
    %125 = vector.load %arg5[%c0_37, %c0_38] : memref<1x32xf32, #tpu.memory_space<vmem>>, vector<1x32xf32>
    %126 = vector.broadcast %125 : vector<1x32xf32> to vector<8x32xf32>
    %127 = arith.addf %124, %126 : vector<8x32xf32>
    %128 = arith.addf %1, %127 : vector<8x32xf32>
    %c0_39 = arith.constant 0 : index
    %c0_40 = arith.constant 0 : index
    %129 = vector.load %arg6[%c0_39, %c0_40] : memref<1x32xf32, #tpu.memory_space<vmem>>, vector<1x32xf32>
    %c0_41 = arith.constant 0 : index
    %c0_42 = arith.constant 0 : index
    %130 = vector.load %arg7[%c0_41, %c0_42] : memref<1x32xf32, #tpu.memory_space<vmem>>, vector<1x32xf32>
    %cst_43 = arith.constant dense<0.000000e+00> : vector<8xf32>
    %131 = vector.multi_reduction <add>, %128, %cst_43 [1] : vector<8x32xf32> to vector<8xf32>
    %132 = vector.shape_cast %131 : vector<8xf32> to vector<8x1xf32>
    %cst_44 = arith.constant 3.200000e+01 : f32
    %133 = vector.broadcast %cst_44 : f32 to vector<8x1xf32>
    %134 = arith.divf %132, %133 : vector<8x1xf32>
    %135 = vector.broadcast %134 : vector<8x1xf32> to vector<8x32xf32>
    %136 = arith.subf %128, %135 : vector<8x32xf32>
    %137 = arith.mulf %136, %136 : vector<8x32xf32>
    %cst_45 = arith.constant dense<0.000000e+00> : vector<8xf32>
    %138 = vector.multi_reduction <add>, %137, %cst_45 [1] : vector<8x32xf32> to vector<8xf32>
    %139 = vector.shape_cast %138 : vector<8xf32> to vector<8x1xf32>
    %cst_46 = arith.constant 3.200000e+01 : f32
    %140 = vector.broadcast %cst_46 : f32 to vector<8x1xf32>
    %141 = arith.divf %139, %140 : vector<8x1xf32>
    %cst_47 = arith.constant 9.99999974E-6 : f32
    %142 = vector.broadcast %cst_47 : f32 to vector<8x1xf32>
    %143 = arith.addf %141, %142 : vector<8x1xf32>
    %144 = math.rsqrt %143 : vector<8x1xf32>
    %145 = vector.broadcast %144 : vector<8x1xf32> to vector<8x32xf32>
    %146 = arith.mulf %136, %145 : vector<8x32xf32>
    %147 = vector.broadcast %129 : vector<1x32xf32> to vector<8x32xf32>
    %148 = arith.mulf %146, %147 : vector<8x32xf32>
    %149 = vector.broadcast %130 : vector<1x32xf32> to vector<8x32xf32>
    %150 = arith.addf %148, %149 : vector<8x32xf32>
    %151 = arith.truncf %150 : vector<8x32xf32> to vector<8x32xbf16>
    %c0_48 = arith.constant 0 : index
    %c0_49 = arith.constant 0 : index
    %152 = vector.load %arg8[%c0_48, %c0_49] : memref<32x128xbf16, #tpu.memory_space<vmem>>, vector<32x128xbf16>
    %cst_50 = arith.constant dense<0.000000e+00> : vector<8x128xf32>
    %153 = tpu.matmul %151, %152, %cst_50 {dimension_numbers = #tpu.dot_dimension_numbers<[1], [0], [0], [1], [0, 0, 1, 1], [], []>} : vector<8x32xbf16>, vector<32x128xbf16>, vector<8x128xf32> -> vector<8x128xf32>
    %c0_51 = arith.constant 0 : index
    %c0_52 = arith.constant 0 : index
    %154 = vector.load %arg9[%c0_51, %c0_52] : memref<1x128xf32, #tpu.memory_space<vmem>>, vector<1x128xf32>
    %155 = vector.broadcast %154 : vector<1x128xf32> to vector<8x128xf32>
    %156 = arith.addf %153, %155 : vector<8x128xf32>
    %cst_53 = arith.constant 5.000000e-01 : f32
    %157 = vector.broadcast %cst_53 : f32 to vector<8x128xf32>
    %158 = arith.mulf %157, %156 : vector<8x128xf32>
    %cst_54 = arith.constant 4.471500e-02 : f32
    %159 = vector.broadcast %cst_54 : f32 to vector<8x128xf32>
    %160 = arith.mulf %159, %156 : vector<8x128xf32>
    %161 = arith.mulf %160, %156 : vector<8x128xf32>
    %162 = arith.mulf %161, %156 : vector<8x128xf32>
    %163 = arith.addf %156, %162 : vector<8x128xf32>
    %cst_55 = arith.constant 0.797884583 : f32
    %164 = vector.broadcast %cst_55 : f32 to vector<8x128xf32>
    %165 = arith.mulf %164, %163 : vector<8x128xf32>
    %166 = math.tanh %165 : vector<8x128xf32>
    %cst_56 = arith.constant 1.000000e+00 : f32
    %167 = vector.broadcast %cst_56 : f32 to vector<8x128xf32>
    %168 = arith.addf %167, %166 : vector<8x128xf32>
    %169 = arith.mulf %158, %168 : vector<8x128xf32>
    %170 = arith.truncf %169 : vector<8x128xf32> to vector<8x128xbf16>
    %c0_57 = arith.constant 0 : index
    %c0_58 = arith.constant 0 : index
    %171 = vector.load %arg10[%c0_57, %c0_58] : memref<128x32xbf16, #tpu.memory_space<vmem>>, vector<128x32xbf16>
    %cst_59 = arith.constant dense<0.000000e+00> : vector<8x32xf32>
    %172 = tpu.matmul %170, %171, %cst_59 {dimension_numbers = #tpu.dot_dimension_numbers<[1], [0], [0], [1], [0, 0, 1, 1], [], []>} : vector<8x128xbf16>, vector<128x32xbf16>, vector<8x32xf32> -> vector<8x32xf32>
    %c0_60 = arith.constant 0 : index
    %c0_61 = arith.constant 0 : index
    %173 = vector.load %arg11[%c0_60, %c0_61] : memref<1x32xf32, #tpu.memory_space<vmem>>, vector<1x32xf32>
    %174 = vector.broadcast %173 : vector<1x32xf32> to vector<8x32xf32>
    %175 = arith.addf %172, %174 : vector<8x32xf32>
    %176 = arith.addf %150, %175 : vector<8x32xf32>
    %c0_62 = arith.constant 0 : index
    %c0_63 = arith.constant 0 : index
    %177 = vector.load %arg12[%c0_62, %c0_63] : memref<1x32xf32, #tpu.memory_space<vmem>>, vector<1x32xf32>
    %c0_64 = arith.constant 0 : index
    %c0_65 = arith.constant 0 : index
    %178 = vector.load %arg13[%c0_64, %c0_65] : memref<1x32xf32, #tpu.memory_space<vmem>>, vector<1x32xf32>
    %cst_66 = arith.constant dense<0.000000e+00> : vector<8xf32>
    %179 = vector.multi_reduction <add>, %176, %cst_66 [1] : vector<8x32xf32> to vector<8xf32>
    %180 = vector.shape_cast %179 : vector<8xf32> to vector<8x1xf32>
    %cst_67 = arith.constant 3.200000e+01 : f32
    %181 = vector.broadcast %cst_67 : f32 to vector<8x1xf32>
    %182 = arith.divf %180, %181 : vector<8x1xf32>
    %183 = vector.broadcast %182 : vector<8x1xf32> to vector<8x32xf32>
    %184 = arith.subf %176, %183 : vector<8x32xf32>
    %185 = arith.mulf %184, %184 : vector<8x32xf32>
    %cst_68 = arith.constant dense<0.000000e+00> : vector<8xf32>
    %186 = vector.multi_reduction <add>, %185, %cst_68 [1] : vector<8x32xf32> to vector<8xf32>
    %187 = vector.shape_cast %186 : vector<8xf32> to vector<8x1xf32>
    %cst_69 = arith.constant 3.200000e+01 : f32
    %188 = vector.broadcast %cst_69 : f32 to vector<8x1xf32>
    %189 = arith.divf %187, %188 : vector<8x1xf32>
    %cst_70 = arith.constant 9.99999974E-6 : f32
    %190 = vector.broadcast %cst_70 : f32 to vector<8x1xf32>
    %191 = arith.addf %189, %190 : vector<8x1xf32>
    %192 = math.rsqrt %191 : vector<8x1xf32>
    %193 = vector.broadcast %192 : vector<8x1xf32> to vector<8x32xf32>
    %194 = arith.mulf %184, %193 : vector<8x32xf32>
    %195 = vector.broadcast %177 : vector<1x32xf32> to vector<8x32xf32>
    %196 = arith.mulf %194, %195 : vector<8x32xf32>
    %197 = vector.broadcast %178 : vector<1x32xf32> to vector<8x32xf32>
    %198 = arith.addf %196, %197 : vector<8x32xf32>
    %199 = arith.truncf %198 : vector<8x32xf32> to vector<8x32xbf16>
    %c0_71 = arith.constant 0 : index
    %c0_72 = arith.constant 0 : index
    %c0_73 = arith.constant 0 : index
    %200 = vector.load %arg14[%c0_71, %c0_72, %c0_73] : memref<1x8x32xbf16, #tpu.memory_space<vmem>>, vector<1x8x32xbf16>
    %201 = vector.shape_cast %200 : vector<1x8x32xbf16> to vector<8x32xbf16>
    %202 = vector.shape_cast %199 : vector<8x32xbf16> to vector<1x8x32xbf16>
    tpu.vector_store %arg14[%c0_71, %c0_72, %c0_73], %202 {strides = array<i32>} : memref<1x8x32xbf16, #tpu.memory_space<vmem>>, vector<1x8x32xbf16>,
    return
  }
  func.func @transform_0(%arg0: i32) -> (i32, i32, i32) {
    %c0_i32 = arith.constant 0 : i32
    %c0_i32_0 = arith.constant 0 : i32
    %c0_i32_1 = arith.constant 0 : i32
    return %arg0, %c0_i32, %c0_i32_0 : i32, i32, i32
  }
  func.func @transform_1(%arg0: i32) -> (i32, i32) {
    %c0_i32 = arith.constant 0 : i32
    %c0_i32_0 = arith.constant 0 : i32
    %c0_i32_1 = arith.constant 0 : i32
    return %c0_i32, %c0_i32_0 : i32, i32
  }
  func.func @transform_2(%arg0: i32) -> (i32, i32) {
    %c0_i32 = arith.constant 0 : i32
    %c0_i32_0 = arith.constant 0 : i32
    %c0_i32_1 = arith.constant 0 : i32
    return %c0_i32, %c0_i32_0 : i32, i32
  }
  func.func @transform_3(%arg0: i32) -> (i32, i32) {
    %c0_i32 = arith.constant 0 : i32
    %c0_i32_0 = arith.constant 0 : i32
    %c0_i32_1 = arith.constant 0 : i32
    return %c0_i32, %c0_i32_0 : i32, i32
  }
  func.func @transform_4(%arg0: i32) -> (i32, i32) {
    %c0_i32 = arith.constant 0 : i32
    %c0_i32_0 = arith.constant 0 : i32
    %c0_i32_1 = arith.constant 0 : i32
    return %c0_i32, %c0_i32_0 : i32, i32
  }
  func.func @transform_5(%arg0: i32) -> (i32, i32) {
    %c0_i32 = arith.constant 0 : i32
    %c0_i32_0 = arith.constant 0 : i32
    %c0_i32_1 = arith.constant 0 : i32
    return %c0_i32, %c0_i32_0 : i32, i32
  }
  func.func @transform_6(%arg0: i32) -> (i32, i32) {
    %c0_i32 = arith.constant 0 : i32
    %c0_i32_0 = arith.constant 0 : i32
    %c0_i32_1 = arith.constant 0 : i32
    return %c0_i32, %c0_i32_0 : i32, i32
  }
  func.func @transform_7(%arg0: i32) -> (i32, i32) {
    %c0_i32 = arith.constant 0 : i32
    %c0_i32_0 = arith.constant 0 : i32
    %c0_i32_1 = arith.constant 0 : i32
    return %c0_i32, %c0_i32_0 : i32, i32
  }
  func.func @transform_8(%arg0: i32) -> (i32, i32) {
    %c0_i32 = arith.constant 0 : i32
    %c0_i32_0 = arith.constant 0 : i32
    %c0_i32_1 = arith.constant 0 : i32
    return %c0_i32, %c0_i32_0 : i32, i32
  }
  func.func @transform_9(%arg0: i32) -> (i32, i32) {
    %c0_i32 = arith.constant 0 : i32
    %c0_i32_0 = arith.constant 0 : i32
    %c0_i32_1 = arith.constant 0 : i32
    return %c0_i32, %c0_i32_0 : i32, i32
  }
  func.func @transform_10(%arg0: i32) -> (i32, i32) {
    %c0_i32 = arith.constant 0 : i32
    %c0_i32_0 = arith.constant 0 : i32
    %c0_i32_1 = arith.constant 0 : i32
    return %c0_i32, %c0_i32_0 : i32, i32
  }
  func.func @transform_11(%arg0: i32) -> (i32, i32) {
    %c0_i32 = arith.constant 0 : i32
    %c0_i32_0 = arith.constant 0 : i32
    %c0_i32_1 = arith.constant 0 : i32
    return %c0_i32, %c0_i32_0 : i32, i32
  }
  func.func @transform_12(%arg0: i32) -> (i32, i32) {
    %c0_i32 = arith.constant 0 : i32
    %c0_i32_0 = arith.constant 0 : i32
    %c0_i32_1 = arith.constant 0 : i32
    return %c0_i32, %c0_i32_0 : i32, i32
  }
  func.func @transform_13(%arg0: i32) -> (i32, i32, i32) {
    %c0_i32 = arith.constant 0 : i32
    %c0_i32_0 = arith.constant 0 : i32
    %c0_i32_1 = arith.constant 0 : i32
    return %arg0, %c0_i32, %c0_i32_0 : i32, i32, i32
  }
}

module attributes {stable_mosaic.version = 11 : i64} {
  func.func @_block_kernel(%arg0: i32, %arg1: memref<1x8x32xbf16, #tpu.memory_space<vmem>>, %arg2: memref<32x96xbf16, #tpu.memory_space<vmem>>, %arg3: memref<1x96xf32, #tpu.memory_space<vmem>>, %arg4: memref<32x32xbf16, #tpu.memory_space<vmem>>, %arg5: memref<1x32xf32, #tpu.memory_space<vmem>>, %arg6: memref<1x32xf32, #tpu.memory_space<vmem>>, %arg7: memref<1x32xf32, #tpu.memory_space<vmem>>, %arg8: memref<32x128xbf16, #tpu.memory_space<vmem>>, %arg9: memref<1x128xf32, #tpu.memory_space<vmem>>, %arg10: memref<128x32xbf16, #tpu.memory_space<vmem>>, %arg11: memref<1x32xf32, #tpu.memory_space<vmem>>, %arg12: memref<1x32xf32, #tpu.memory_space<vmem>>, %arg13: memref<1x32xf32, #tpu.memory_space<vmem>>, %arg14: memref<1x8x32xbf16, #tpu.memory_space<vmem>>) attributes {dimension_semantics = [#tpu.dimension_semantics<parallel>], iteration_bounds = array<i64: 2>, scalar_prefetch = 0 : i64, scratch_operands = 0 : i64, tpu.core_type = #tpu.core_type<tc>, window_params = [{transform_indices = @transform_0, window_bounds = array<i64: 1, 8, 32>}, {pipeline_mode = #tpu.pipeline_mode<synchronous>, transform_indices = @transform_1, window_bounds = array<i64: 32, 96>}, {pipeline_mode = #tpu.pipeline_mode<synchronous>, transform_indices = @transform_2, window_bounds = array<i64: 1, 96>}, {pipeline_mode = #tpu.pipeline_mode<synchronous>, transform_indices = @transform_3, window_bounds = array<i64: 32, 32>}, {pipeline_mode = #tpu.pipeline_mode<synchronous>, transform_indices = @transform_4, window_bounds = array<i64: 1, 32>}, {pipeline_mode = #tpu.pipeline_mode<synchronous>, transform_indices = @transform_5, window_bounds = array<i64: 1, 32>}, {pipeline_mode = #tpu.pipeline_mode<synchronous>, transform_indices = @transform_6, window_bounds = array<i64: 1, 32>}, {pipeline_mode = #tpu.pipeline_mode<synchronous>, transform_indices = @transform_7, window_bounds = array<i64: 32, 128>}, {pipeline_mode = #tpu.pipeline_mode<synchronous>, transform_indices = @transform_8, window_bounds = array<i64: 1, 128>}, {pipeline_mode = #tpu.pipeline_mode<synchronous>, transform_indices = @transform_9, window_bounds = array<i64: 128, 32>}, {pipeline_mode = #tpu.pipeline_mode<synchronous>, transform_indices = @transform_10, window_bounds = array<i64: 1, 32>}, {pipeline_mode = #tpu.pipeline_mode<synchronous>, transform_indices = @transform_11, window_bounds = array<i64: 1, 32>}, {pipeline_mode = #tpu.pipeline_mode<synchronous>, transform_indices = @transform_12, window_bounds = array<i64: 1, 32>}, {transform_indices = @transform_13, window_bounds = array<i64: 1, 8, 32>}]} {
    %c0 = arith.constant 0 : index
    %c0_0 = arith.constant 0 : index
    %c0_1 = arith.constant 0 : index
    %0 = vector.load %arg1[%c0, %c0_0, %c0_1] : memref<1x8x32xbf16, #tpu.memory_space<vmem>>, vector<1x8x32xbf16>
    %1 = vector.shape_cast %0 : vector<1x8x32xbf16> to vector<8x32xbf16>
    %2 = arith.extf %1 : vector<8x32xbf16> to vector<8x32xf32>
    %c0_2 = arith.constant 0 : index
    %c0_3 = arith.constant 0 : index
    %3 = vector.load %arg2[%c0_2, %c0_3] : memref<32x96xbf16, #tpu.memory_space<vmem>>, vector<32x96xbf16>
    %cst = arith.constant dense<0.000000e+00> : vector<8x96xf32>
    %4 = tpu.matmul %1, %3, %cst {dimension_numbers = #tpu.dot_dimension_numbers<[1], [0], [0], [1], [0, 0, 1, 1], [], []>} : vector<8x32xbf16>, vector<32x96xbf16>, vector<8x96xf32> -> vector<8x96xf32>
    %c0_4 = arith.constant 0 : index
    %c0_5 = arith.constant 0 : index
    %5 = vector.load %arg3[%c0_4, %c0_5] : memref<1x96xf32, #tpu.memory_space<vmem>>, vector<1x96xf32>
    %6 = vector.broadcast %5 : vector<1x96xf32> to vector<8x96xf32>
    %7 = arith.addf %4, %6 : vector<8x96xf32>
    %8 = tpu.iota {dimensions = array<i32: 0>} : vector<8x8xi32>
    %9 = tpu.iota {dimensions = array<i32: 1>} : vector<8x8xi32>
    %10 = arith.cmpi sle, %9, %8 : vector<8x8xi32>
    %c0_6 = arith.constant 0 : index
    %c0_7 = arith.constant 0 : index
    %11 = vector.load %arg4[%c0_6, %c0_7] : memref<32x32xbf16, #tpu.memory_space<vmem>>, vector<32x32xbf16>
    %cst_8 = arith.constant 0.000000e+00 : f32
    %12 = vector.broadcast %cst_8 : f32 to vector<8x32xf32>
    %13 = vector.extract_strided_slice %7 {offsets = [0, 0], sizes = [8, 8], strides = [1, 1]} : vector<8x96xf32> to vector<8x8xf32>
    %14 = arith.truncf %13 : vector<8x8xf32> to vector<8x8xbf16>
    %15 = vector.extract_strided_slice %7 {offsets = [0, 32], sizes = [8, 8], strides = [1, 1]} : vector<8x96xf32> to vector<8x8xf32>
    %16 = arith.truncf %15 : vector<8x8xf32> to vector<8x8xbf16>
    %17 = vector.extract_strided_slice %7 {offsets = [0, 64], sizes = [8, 8], strides = [1, 1]} : vector<8x96xf32> to vector<8x8xf32>
    %18 = arith.truncf %17 : vector<8x8xf32> to vector<8x8xbf16>
    %19 = tpu.transpose %16, [1, 0] : vector<8x8xbf16> -> vector<8x8xbf16>
    %cst_9 = arith.constant dense<0.000000e+00> : vector<8x8xf32>
    %20 = tpu.matmul %14, %19, %cst_9 {dimension_numbers = #tpu.dot_dimension_numbers<[1], [0], [0], [1], [0, 0, 1, 1], [], []>} : vector<8x8xbf16>, vector<8x8xbf16>, vector<8x8xf32> -> vector<8x8xf32>
    %cst_10 = arith.constant 0.353553385 : f32
    %21 = vector.broadcast %cst_10 : f32 to vector<8x8xf32>
    %22 = arith.mulf %20, %21 : vector<8x8xf32>
    %cst_11 = arith.constant -1.000000e+09 : f32
    %23 = vector.broadcast %cst_11 : f32 to vector<8x8xf32>
    %24 = arith.select %10, %22, %23 : vector<8x8xi1>, vector<8x8xf32>
    %cst_12 = arith.constant dense<0xFF800000> : vector<8xf32>
    %25 = vector.multi_reduction <maximumf>, %24, %cst_12 [1] : vector<8x8xf32> to vector<8xf32>
    %26 = vector.shape_cast %25 : vector<8xf32> to vector<8x1xf32>
    %27 = vector.broadcast %26 : vector<8x1xf32> to vector<8x8xf32>
    %28 = arith.subf %24, %27 : vector<8x8xf32>
    %29 = math.exp %28 : vector<8x8xf32>
    %cst_13 = arith.constant dense<0.000000e+00> : vector<8xf32>
    %30 = vector.multi_reduction <add>, %29, %cst_13 [1] : vector<8x8xf32> to vector<8xf32>
    %31 = vector.shape_cast %30 : vector<8xf32> to vector<8x1xf32>
    %32 = tpu.reciprocal %31 : vector<8x1xf32> -> vector<8x1xf32>
    %33 = vector.broadcast %32 : vector<8x1xf32> to vector<8x8xf32>
    %34 = arith.mulf %29, %33 : vector<8x8xf32>
    %35 = arith.truncf %34 : vector<8x8xf32> to vector<8x8xbf16>
    %cst_14 = arith.constant dense<0.000000e+00> : vector<8x8xf32>
    %36 = tpu.matmul %35, %18, %cst_14 {dimension_numbers = #tpu.dot_dimension_numbers<[1], [0], [0], [1], [0, 0, 1, 1], [], []>} : vector<8x8xbf16>, vector<8x8xbf16>, vector<8x8xf32> -> vector<8x8xf32>
    %37 = arith.truncf %36 : vector<8x8xf32> to vector<8x8xbf16>
    %38 = vector.extract_strided_slice %11 {offsets = [0, 0], sizes = [8, 32], strides = [1, 1]} : vector<32x32xbf16> to vector<8x32xbf16>
    %cst_15 = arith.constant dense<0.000000e+00> : vector<8x32xf32>
    %39 = tpu.matmul %37, %38, %cst_15 {dimension_numbers = #tpu.dot_dimension_numbers<[1], [0], [0], [1], [0, 0, 1, 1], [], []>} : vector<8x8xbf16>, vector<8x32xbf16>, vector<8x32xf32> -> vector<8x32xf32>
    %40 = arith.addf %12, %39 : vector<8x32xf32>
    %41 = vector.extract_strided_slice %7 {offsets = [0, 8], sizes = [8, 8], strides = [1, 1]} : vector<8x96xf32> to vector<8x8xf32>
    %42 = arith.truncf %41 : vector<8x8xf32> to vector<8x8xbf16>
    %43 = vector.extract_strided_slice %7 {offsets = [0, 40], sizes = [8, 8], strides = [1, 1]} : vector<8x96xf32> to vector<8x8xf32>
    %44 = arith.truncf %43 : vector<8x8xf32> to vector<8x8xbf16>
    %45 = vector.extract_strided_slice %7 {offsets = [0, 72], sizes = [8, 8], strides = [1, 1]} : vector<8x96xf32> to vector<8x8xf32>
    %46 = arith.truncf %45 : vector<8x8xf32> to vector<8x8xbf16>
    %47 = tpu.transpose %44, [1, 0] : vector<8x8xbf16> -> vector<8x8xbf16>
    %cst_16 = arith.constant dense<0.000000e+00> : vector<8x8xf32>
    %48 = tpu.matmul %42, %47, %cst_16 {dimension_numbers = #tpu.dot_dimension_numbers<[1], [0], [0], [1], [0, 0, 1, 1], [], []>} : vector<8x8xbf16>, vector<8x8xbf16>, vector<8x8xf32> -> vector<8x8xf32>
    %cst_17 = arith.constant 0.353553385 : f32
    %49 = vector.broadcast %cst_17 : f32 to vector<8x8xf32>
    %50 = arith.mulf %48, %49 : vector<8x8xf32>
    %cst_18 = arith.constant -1.000000e+09 : f32
    %51 = vector.broadcast %cst_18 : f32 to vector<8x8xf32>
    %52 = arith.select %10, %50, %51 : vector<8x8xi1>, vector<8x8xf32>
    %cst_19 = arith.constant dense<0xFF800000> : vector<8xf32>
    %53 = vector.multi_reduction <maximumf>, %52, %cst_19 [1] : vector<8x8xf32> to vector<8xf32>
    %54 = vector.shape_cast %53 : vector<8xf32> to vector<8x1xf32>
    %55 = vector.broadcast %54 : vector<8x1xf32> to vector<8x8xf32>
    %56 = arith.subf %52, %55 : vector<8x8xf32>
    %57 = math.exp %56 : vector<8x8xf32>
    %cst_20 = arith.constant dense<0.000000e+00> : vector<8xf32>
    %58 = vector.multi_reduction <add>, %57, %cst_20 [1] : vector<8x8xf32> to vector<8xf32>
    %59 = vector.shape_cast %58 : vector<8xf32> to vector<8x1xf32>
    %60 = tpu.reciprocal %59 : vector<8x1xf32> -> vector<8x1xf32>
    %61 = vector.broadcast %60 : vector<8x1xf32> to vector<8x8xf32>
    %62 = arith.mulf %57, %61 : vector<8x8xf32>
    %63 = arith.truncf %62 : vector<8x8xf32> to vector<8x8xbf16>
    %cst_21 = arith.constant dense<0.000000e+00> : vector<8x8xf32>
    %64 = tpu.matmul %63, %46, %cst_21 {dimension_numbers = #tpu.dot_dimension_numbers<[1], [0], [0], [1], [0, 0, 1, 1], [], []>} : vector<8x8xbf16>, vector<8x8xbf16>, vector<8x8xf32> -> vector<8x8xf32>
    %65 = arith.truncf %64 : vector<8x8xf32> to vector<8x8xbf16>
    %66 = vector.extract_strided_slice %11 {offsets = [8, 0], sizes = [8, 32], strides = [1, 1]} : vector<32x32xbf16> to vector<8x32xbf16>
    %cst_22 = arith.constant dense<0.000000e+00> : vector<8x32xf32>
    %67 = tpu.matmul %65, %66, %cst_22 {dimension_numbers = #tpu.dot_dimension_numbers<[1], [0], [0], [1], [0, 0, 1, 1], [], []>} : vector<8x8xbf16>, vector<8x32xbf16>, vector<8x32xf32> -> vector<8x32xf32>
    %68 = arith.addf %40, %67 : vector<8x32xf32>
    %69 = vector.extract_strided_slice %7 {offsets = [0, 16], sizes = [8, 8], strides = [1, 1]} : vector<8x96xf32> to vector<8x8xf32>
    %70 = arith.truncf %69 : vector<8x8xf32> to vector<8x8xbf16>
    %71 = vector.extract_strided_slice %7 {offsets = [0, 48], sizes = [8, 8], strides = [1, 1]} : vector<8x96xf32> to vector<8x8xf32>
    %72 = arith.truncf %71 : vector<8x8xf32> to vector<8x8xbf16>
    %73 = vector.extract_strided_slice %7 {offsets = [0, 80], sizes = [8, 8], strides = [1, 1]} : vector<8x96xf32> to vector<8x8xf32>
    %74 = arith.truncf %73 : vector<8x8xf32> to vector<8x8xbf16>
    %75 = tpu.transpose %72, [1, 0] : vector<8x8xbf16> -> vector<8x8xbf16>
    %cst_23 = arith.constant dense<0.000000e+00> : vector<8x8xf32>
    %76 = tpu.matmul %70, %75, %cst_23 {dimension_numbers = #tpu.dot_dimension_numbers<[1], [0], [0], [1], [0, 0, 1, 1], [], []>} : vector<8x8xbf16>, vector<8x8xbf16>, vector<8x8xf32> -> vector<8x8xf32>
    %cst_24 = arith.constant 0.353553385 : f32
    %77 = vector.broadcast %cst_24 : f32 to vector<8x8xf32>
    %78 = arith.mulf %76, %77 : vector<8x8xf32>
    %cst_25 = arith.constant -1.000000e+09 : f32
    %79 = vector.broadcast %cst_25 : f32 to vector<8x8xf32>
    %80 = arith.select %10, %78, %79 : vector<8x8xi1>, vector<8x8xf32>
    %cst_26 = arith.constant dense<0xFF800000> : vector<8xf32>
    %81 = vector.multi_reduction <maximumf>, %80, %cst_26 [1] : vector<8x8xf32> to vector<8xf32>
    %82 = vector.shape_cast %81 : vector<8xf32> to vector<8x1xf32>
    %83 = vector.broadcast %82 : vector<8x1xf32> to vector<8x8xf32>
    %84 = arith.subf %80, %83 : vector<8x8xf32>
    %85 = math.exp %84 : vector<8x8xf32>
    %cst_27 = arith.constant dense<0.000000e+00> : vector<8xf32>
    %86 = vector.multi_reduction <add>, %85, %cst_27 [1] : vector<8x8xf32> to vector<8xf32>
    %87 = vector.shape_cast %86 : vector<8xf32> to vector<8x1xf32>
    %88 = tpu.reciprocal %87 : vector<8x1xf32> -> vector<8x1xf32>
    %89 = vector.broadcast %88 : vector<8x1xf32> to vector<8x8xf32>
    %90 = arith.mulf %85, %89 : vector<8x8xf32>
    %91 = arith.truncf %90 : vector<8x8xf32> to vector<8x8xbf16>
    %cst_28 = arith.constant dense<0.000000e+00> : vector<8x8xf32>
    %92 = tpu.matmul %91, %74, %cst_28 {dimension_numbers = #tpu.dot_dimension_numbers<[1], [0], [0], [1], [0, 0, 1, 1], [], []>} : vector<8x8xbf16>, vector<8x8xbf16>, vector<8x8xf32> -> vector<8x8xf32>
    %93 = arith.truncf %92 : vector<8x8xf32> to vector<8x8xbf16>
    %94 = vector.extract_strided_slice %11 {offsets = [16, 0], sizes = [8, 32], strides = [1, 1]} : vector<32x32xbf16> to vector<8x32xbf16>
    %cst_29 = arith.constant dense<0.000000e+00> : vector<8x32xf32>
    %95 = tpu.matmul %93, %94, %cst_29 {dimension_numbers = #tpu.dot_dimension_numbers<[1], [0], [0], [1], [0, 0, 1, 1], [], []>} : vector<8x8xbf16>, vector<8x32xbf16>, vector<8x32xf32> -> vector<8x32xf32>
    %96 = arith.addf %68, %95 : vector<8x32xf32>
    %97 = vector.extract_strided_slice %7 {offsets = [0, 24], sizes = [8, 8], strides = [1, 1]} : vector<8x96xf32> to vector<8x8xf32>
    %98 = arith.truncf %97 : vector<8x8xf32> to vector<8x8xbf16>
    %99 = vector.extract_strided_slice %7 {offsets = [0, 56], sizes = [8, 8], strides = [1, 1]} : vector<8x96xf32> to vector<8x8xf32>
    %100 = arith.truncf %99 : vector<8x8xf32> to vector<8x8xbf16>
    %101 = vector.extract_strided_slice %7 {offsets = [0, 88], sizes = [8, 8], strides = [1, 1]} : vector<8x96xf32> to vector<8x8xf32>
    %102 = arith.truncf %101 : vector<8x8xf32> to vector<8x8xbf16>
    %103 = tpu.transpose %100, [1, 0] : vector<8x8xbf16> -> vector<8x8xbf16>
    %cst_30 = arith.constant dense<0.000000e+00> : vector<8x8xf32>
    %104 = tpu.matmul %98, %103, %cst_30 {dimension_numbers = #tpu.dot_dimension_numbers<[1], [0], [0], [1], [0, 0, 1, 1], [], []>} : vector<8x8xbf16>, vector<8x8xbf16>, vector<8x8xf32> -> vector<8x8xf32>
    %cst_31 = arith.constant 0.353553385 : f32
    %105 = vector.broadcast %cst_31 : f32 to vector<8x8xf32>
    %106 = arith.mulf %104, %105 : vector<8x8xf32>
    %cst_32 = arith.constant -1.000000e+09 : f32
    %107 = vector.broadcast %cst_32 : f32 to vector<8x8xf32>
    %108 = arith.select %10, %106, %107 : vector<8x8xi1>, vector<8x8xf32>
    %cst_33 = arith.constant dense<0xFF800000> : vector<8xf32>
    %109 = vector.multi_reduction <maximumf>, %108, %cst_33 [1] : vector<8x8xf32> to vector<8xf32>
    %110 = vector.shape_cast %109 : vector<8xf32> to vector<8x1xf32>
    %111 = vector.broadcast %110 : vector<8x1xf32> to vector<8x8xf32>
    %112 = arith.subf %108, %111 : vector<8x8xf32>
    %113 = math.exp %112 : vector<8x8xf32>
    %cst_34 = arith.constant dense<0.000000e+00> : vector<8xf32>
    %114 = vector.multi_reduction <add>, %113, %cst_34 [1] : vector<8x8xf32> to vector<8xf32>
    %115 = vector.shape_cast %114 : vector<8xf32> to vector<8x1xf32>
    %116 = tpu.reciprocal %115 : vector<8x1xf32> -> vector<8x1xf32>
    %117 = vector.broadcast %116 : vector<8x1xf32> to vector<8x8xf32>
    %118 = arith.mulf %113, %117 : vector<8x8xf32>
    %119 = arith.truncf %118 : vector<8x8xf32> to vector<8x8xbf16>
    %cst_35 = arith.constant dense<0.000000e+00> : vector<8x8xf32>
    %120 = tpu.matmul %119, %102, %cst_35 {dimension_numbers = #tpu.dot_dimension_numbers<[1], [0], [0], [1], [0, 0, 1, 1], [], []>} : vector<8x8xbf16>, vector<8x8xbf16>, vector<8x8xf32> -> vector<8x8xf32>
    %121 = arith.truncf %120 : vector<8x8xf32> to vector<8x8xbf16>
    %122 = vector.extract_strided_slice %11 {offsets = [24, 0], sizes = [8, 32], strides = [1, 1]} : vector<32x32xbf16> to vector<8x32xbf16>
    %cst_36 = arith.constant dense<0.000000e+00> : vector<8x32xf32>
    %123 = tpu.matmul %121, %122, %cst_36 {dimension_numbers = #tpu.dot_dimension_numbers<[1], [0], [0], [1], [0, 0, 1, 1], [], []>} : vector<8x8xbf16>, vector<8x32xbf16>, vector<8x32xf32> -> vector<8x32xf32>
    %124 = arith.addf %96, %123 : vector<8x32xf32>
    %c0_37 = arith.constant 0 : index
    %c0_38 = arith.constant 0 : index
    %125 = vector.load %arg5[%c0_37, %c0_38] : memref<1x32xf32, #tpu.memory_space<vmem>>, vector<1x32xf32>
    %126 = vector.broadcast %125 : vector<1x32xf32> to vector<8x32xf32>
    %127 = arith.addf %124, %126 : vector<8x32xf32>
    %128 = arith.addf %2, %127 : vector<8x32xf32>
    %c0_39 = arith.constant 0 : index
    %c0_40 = arith.constant 0 : index
    %129 = vector.load %arg6[%c0_39, %c0_40] : memref<1x32xf32, #tpu.memory_space<vmem>>, vector<1x32xf32>
    %c0_41 = arith.constant 0 : index
    %c0_42 = arith.constant 0 : index
    %130 = vector.load %arg7[%c0_41, %c0_42] : memref<1x32xf32, #tpu.memory_space<vmem>>, vector<1x32xf32>
    %cst_43 = arith.constant dense<0.000000e+00> : vector<8xf32>
    %131 = vector.multi_reduction <add>, %128, %cst_43 [1] : vector<8x32xf32> to vector<8xf32>
    %132 = vector.shape_cast %131 : vector<8xf32> to vector<8x1xf32>
    %cst_44 = arith.constant 3.200000e+01 : f32
    %133 = vector.broadcast %cst_44 : f32 to vector<8x1xf32>
    %134 = arith.divf %132, %133 : vector<8x1xf32>
    %135 = vector.broadcast %134 : vector<8x1xf32> to vector<8x32xf32>
    %136 = arith.subf %128, %135 : vector<8x32xf32>
    %137 = arith.mulf %136, %136 : vector<8x32xf32>
    %cst_45 = arith.constant dense<0.000000e+00> : vector<8xf32>
    %138 = vector.multi_reduction <add>, %137, %cst_45 [1] : vector<8x32xf32> to vector<8xf32>
    %139 = vector.shape_cast %138 : vector<8xf32> to vector<8x1xf32>
    %cst_46 = arith.constant 3.200000e+01 : f32
    %140 = vector.broadcast %cst_46 : f32 to vector<8x1xf32>
    %141 = arith.divf %139, %140 : vector<8x1xf32>
    %cst_47 = arith.constant 9.99999974E-6 : f32
    %142 = vector.broadcast %cst_47 : f32 to vector<8x1xf32>
    %143 = arith.addf %141, %142 : vector<8x1xf32>
    %144 = math.rsqrt %143 : vector<8x1xf32>
    %145 = vector.broadcast %144 : vector<8x1xf32> to vector<8x32xf32>
    %146 = arith.mulf %136, %145 : vector<8x32xf32>
    %147 = vector.broadcast %129 : vector<1x32xf32> to vector<8x32xf32>
    %148 = arith.mulf %146, %147 : vector<8x32xf32>
    %149 = vector.broadcast %130 : vector<1x32xf32> to vector<8x32xf32>
    %150 = arith.addf %148, %149 : vector<8x32xf32>
    %151 = arith.truncf %150 : vector<8x32xf32> to vector<8x32xbf16>
    %c0_48 = arith.constant 0 : index
    %c0_49 = arith.constant 0 : index
    %152 = vector.load %arg8[%c0_48, %c0_49] : memref<32x128xbf16, #tpu.memory_space<vmem>>, vector<32x128xbf16>
    %cst_50 = arith.constant dense<0.000000e+00> : vector<8x128xf32>
    %153 = tpu.matmul %151, %152, %cst_50 {dimension_numbers = #tpu.dot_dimension_numbers<[1], [0], [0], [1], [0, 0, 1, 1], [], []>} : vector<8x32xbf16>, vector<32x128xbf16>, vector<8x128xf32> -> vector<8x128xf32>
    %c0_51 = arith.constant 0 : index
    %c0_52 = arith.constant 0 : index
    %154 = vector.load %arg9[%c0_51, %c0_52] : memref<1x128xf32, #tpu.memory_space<vmem>>, vector<1x128xf32>
    %155 = vector.broadcast %154 : vector<1x128xf32> to vector<8x128xf32>
    %156 = arith.addf %153, %155 : vector<8x128xf32>
    %cst_53 = arith.constant 5.000000e-01 : f32
    %157 = vector.broadcast %cst_53 : f32 to vector<8x128xf32>
    %158 = arith.mulf %157, %156 : vector<8x128xf32>
    %cst_54 = arith.constant 4.471500e-02 : f32
    %159 = vector.broadcast %cst_54 : f32 to vector<8x128xf32>
    %160 = arith.mulf %159, %156 : vector<8x128xf32>
    %161 = arith.mulf %160, %156 : vector<8x128xf32>
    %162 = arith.mulf %161, %156 : vector<8x128xf32>
    %163 = arith.addf %156, %162 : vector<8x128xf32>
    %cst_55 = arith.constant 0.797884583 : f32
    %164 = vector.broadcast %cst_55 : f32 to vector<8x128xf32>
    %165 = arith.mulf %164, %163 : vector<8x128xf32>
    %166 = math.tanh %165 : vector<8x128xf32>
    %cst_56 = arith.constant 1.000000e+00 : f32
    %167 = vector.broadcast %cst_56 : f32 to vector<8x128xf32>
    %168 = arith.addf %167, %166 : vector<8x128xf32>
    %169 = arith.mulf %158, %168 : vector<8x128xf32>
    %170 = arith.truncf %169 : vector<8x128xf32> to vector<8x128xbf16>
    %c0_57 = arith.constant 0 : index
    %c0_58 = arith.constant 0 : index
    %171 = vector.load %arg10[%c0_57, %c0_58] : memref<128x32xbf16, #tpu.memory_space<vmem>>, vector<128x32xbf16>
    %cst_59 = arith.constant dense<0.000000e+00> : vector<8x32xf32>
    %172 = tpu.matmul %170, %171, %cst_59 {dimension_numbers = #tpu.dot_dimension_numbers<[1], [0], [0], [1], [0, 0, 1, 1], [], []>} : vector<8x128xbf16>, vector<128x32xbf16>, vector<8x32xf32> -> vector<8x32xf32>
    %c0_60 = arith.constant 0 : index
    %c0_61 = arith.constant 0 : index
    %173 = vector.load %arg11[%c0_60, %c0_61] : memref<1x32xf32, #tpu.memory_space<vmem>>, vector<1x32xf32>
    %174 = vector.broadcast %173 : vector<1x32xf32> to vector<8x32xf32>
    %175 = arith.addf %172, %174 : vector<8x32xf32>
    %176 = arith.addf %150, %175 : vector<8x32xf32>
    %c0_62 = arith.constant 0 : index
    %c0_63 = arith.constant 0 : index
    %177 = vector.load %arg12[%c0_62, %c0_63] : memref<1x32xf32, #tpu.memory_space<vmem>>, vector<1x32xf32>
    %c0_64 = arith.constant 0 : index
    %c0_65 = arith.constant 0 : index
    %178 = vector.load %arg13[%c0_64, %c0_65] : memref<1x32xf32, #tpu.memory_space<vmem>>, vector<1x32xf32>
    %cst_66 = arith.constant dense<0.000000e+00> : vector<8xf32>
    %179 = vector.multi_reduction <add>, %176, %cst_66 [1] : vector<8x32xf32> to vector<8xf32>
    %180 = vector.shape_cast %179 : vector<8xf32> to vector<8x1xf32>
    %cst_67 = arith.constant 3.200000e+01 : f32
    %181 = vector.broadcast %cst_67 : f32 to vector<8x1xf32>
    %182 = arith.divf %180, %181 : vector<8x1xf32>
    %183 = vector.broadcast %182 : vector<8x1xf32> to vector<8x32xf32>
    %184 = arith.subf %176, %183 : vector<8x32xf32>
    %185 = arith.mulf %184, %184 : vector<8x32xf32>
    %cst_68 = arith.constant dense<0.000000e+00> : vector<8xf32>
    %186 = vector.multi_reduction <add>, %185, %cst_68 [1] : vector<8x32xf32> to vector<8xf32>
    %187 = vector.shape_cast %186 : vector<8xf32> to vector<8x1xf32>
    %cst_69 = arith.constant 3.200000e+01 : f32
    %188 = vector.broadcast %cst_69 : f32 to vector<8x1xf32>
    %189 = arith.divf %187, %188 : vector<8x1xf32>
    %cst_70 = arith.constant 9.99999974E-6 : f32
    %190 = vector.broadcast %cst_70 : f32 to vector<8x1xf32>
    %191 = arith.addf %189, %190 : vector<8x1xf32>
    %192 = math.rsqrt %191 : vector<8x1xf32>
    %193 = vector.broadcast %192 : vector<8x1xf32> to vector<8x32xf32>
    %194 = arith.mulf %184, %193 : vector<8x32xf32>
    %195 = vector.broadcast %177 : vector<1x32xf32> to vector<8x32xf32>
    %196 = arith.mulf %194, %195 : vector<8x32xf32>
    %197 = vector.broadcast %178 : vector<1x32xf32> to vector<8x32xf32>
    %198 = arith.addf %196, %197 : vector<8x32xf32>
    %199 = arith.truncf %198 : vector<8x32xf32> to vector<8x32xbf16>
    %c0_71 = arith.constant 0 : index
    %c0_72 = arith.constant 0 : index
    %c0_73 = arith.constant 0 : index
    %200 = vector.load %arg14[%c0_71, %c0_72, %c0_73] : memref<1x8x32xbf16, #tpu.memory_space<vmem>>, vector<1x8x32xbf16>
    %201 = vector.shape_cast %200 : vector<1x8x32xbf16> to vector<8x32xbf16>
    %202 = vector.shape_cast %199 : vector<8x32xbf16> to vector<1x8x32xbf16>
    tpu.vector_store %arg14[%c0_71, %c0_72, %c0_73], %202 {strides = array<i32>} : memref<1x8x32xbf16, #tpu.memory_space<vmem>>, vector<1x8x32xbf16>,
    return
  }
  func.func @transform_0(%arg0: i32) -> (i32, i32, i32) {
    %c0_i32 = arith.constant 0 : i32
    %c0_i32_0 = arith.constant 0 : i32
    %c0_i32_1 = arith.constant 0 : i32
    return %arg0, %c0_i32, %c0_i32_0 : i32, i32, i32
  }
  func.func @transform_1(%arg0: i32) -> (i32, i32) {
    %c0_i32 = arith.constant 0 : i32
    %c0_i32_0 = arith.constant 0 : i32
    %c0_i32_1 = arith.constant 0 : i32
    return %c0_i32, %c0_i32_0 : i32, i32
  }
  func.func @transform_2(%arg0: i32) -> (i32, i32) {
    %c0_i32 = arith.constant 0 : i32
    %c0_i32_0 = arith.constant 0 : i32
    %c0_i32_1 = arith.constant 0 : i32
    return %c0_i32, %c0_i32_0 : i32, i32
  }
  func.func @transform_3(%arg0: i32) -> (i32, i32) {
    %c0_i32 = arith.constant 0 : i32
    %c0_i32_0 = arith.constant 0 : i32
    %c0_i32_1 = arith.constant 0 : i32
    return %c0_i32, %c0_i32_0 : i32, i32
  }
  func.func @transform_4(%arg0: i32) -> (i32, i32) {
    %c0_i32 = arith.constant 0 : i32
    %c0_i32_0 = arith.constant 0 : i32
    %c0_i32_1 = arith.constant 0 : i32
    return %c0_i32, %c0_i32_0 : i32, i32
  }
  func.func @transform_5(%arg0: i32) -> (i32, i32) {
    %c0_i32 = arith.constant 0 : i32
    %c0_i32_0 = arith.constant 0 : i32
    %c0_i32_1 = arith.constant 0 : i32
    return %c0_i32, %c0_i32_0 : i32, i32
  }
  func.func @transform_6(%arg0: i32) -> (i32, i32) {
    %c0_i32 = arith.constant 0 : i32
    %c0_i32_0 = arith.constant 0 : i32
    %c0_i32_1 = arith.constant 0 : i32
    return %c0_i32, %c0_i32_0 : i32, i32
  }
  func.func @transform_7(%arg0: i32) -> (i32, i32) {
    %c0_i32 = arith.constant 0 : i32
    %c0_i32_0 = arith.constant 0 : i32
    %c0_i32_1 = arith.constant 0 : i32
    return %c0_i32, %c0_i32_0 : i32, i32
  }
  func.func @transform_8(%arg0: i32) -> (i32, i32) {
    %c0_i32 = arith.constant 0 : i32
    %c0_i32_0 = arith.constant 0 : i32
    %c0_i32_1 = arith.constant 0 : i32
    return %c0_i32, %c0_i32_0 : i32, i32
  }
  func.func @transform_9(%arg0: i32) -> (i32, i32) {
    %c0_i32 = arith.constant 0 : i32
    %c0_i32_0 = arith.constant 0 : i32
    %c0_i32_1 = arith.constant 0 : i32
    return %c0_i32, %c0_i32_0 : i32, i32
  }
  func.func @transform_10(%arg0: i32) -> (i32, i32) {
    %c0_i32 = arith.constant 0 : i32
    %c0_i32_0 = arith.constant 0 : i32
    %c0_i32_1 = arith.constant 0 : i32
    return %c0_i32, %c0_i32_0 : i32, i32
  }
  func.func @transform_11(%arg0: i32) -> (i32, i32) {
    %c0_i32 = arith.constant 0 : i32
    %c0_i32_0 = arith.constant 0 : i32
    %c0_i32_1 = arith.constant 0 : i32
    return %c0_i32, %c0_i32_0 : i32, i32
  }
  func.func @transform_12(%arg0: i32) -> (i32, i32) {
    %c0_i32 = arith.constant 0 : i32
    %c0_i32_0 = arith.constant 0 : i32
    %c0_i32_1 = arith.constant 0 : i32
    return %c0_i32, %c0_i32_0 : i32, i32
  }
  func.func @transform_13(%arg0: i32) -> (i32, i32, i32) {
    %c0_i32 = arith.constant 0 : i32
    %c0_i32_0 = arith.constant 0 : i32
    %c0_i32_1 = arith.constant 0 : i32
    return %arg0, %c0_i32, %c0_i32_0 : i32, i32, i32
  }
}

</mosaic_0001>

<bundles_post_ra>
// kernel: model_forward.2
= control target key start
LH: loop header
LB: loop body
LE: loop exit
PB: predicated region body
PF: predicated region fallthrough
CT: control target
= control target key end

     0   :  { %s1804_s25 = smov 0   ;;  %s2032_s0 = inlined_call_operand.vmem [shape: f32[2,8,32], index: 0, kind: input, shape index: {}]   ;;  %s2033_s1 = inlined_call_operand.vmem [shape: bf16[32,96], index: 1, kind: input, shape index: {}]   ;;  %s2034_s2 = inlined_call_operand.vmem [shape: f32[1,96], index: 2, kind: input, shape index: {}]   ;;  %s2035_s3 = inlined_call_operand.vmem [shape: bf16[32,32], index: 3, kind: input, shape index: {}]   ;;  %s2036_s4 = inlined_call_operand.vmem [shape: f32[1,32], index: 4, kind: input, shape index: {}]   ;;  %s2037_s5 = inlined_call_operand.vmem [shape: f32[1,32], index: 5, kind: input, shape index: {}]   ;;  %s2038_s6 = inlined_call_operand.vmem [shape: f32[1,32], index: 6, kind: input, shape index: {}]   ;;  %s2039_s7 = inlined_call_operand.vmem [shape: bf16[32,128], index: 7, kind: input, shape index: {}]   ;;  %s2040_s8 = inlined_call_operand.vmem [shape: f32[1,128], index: 8, kind: input, shape index: {}]   ;;  %s2041_s9 = inlined_call_operand.vmem [shape: bf16[128,32], index: 9, kind: input, shape index: {}]   ;;  %s2042_s10 = inlined_call_operand.vmem [shape: f32[1,32], index: 10, kind: input, shape index: {}]   ;;  %s2043_s11 = inlined_call_operand.vmem [shape: f32[1,32], index: 11, kind: input, shape index: {}]   ;;  %s2044_s12 = inlined_call_operand.vmem [shape: f32[1,32], index: 12, kind: input, shape index: {}]   ;;  %s2045_s13 = inlined_call_operand.vmem [shape: bf16[2,8,32], index: 13, kind: output, shape index: {}]  }
   0x1 LB: > { %s1468_s26 = sadd.s32 4294967295, %s1719_s25   ;;  %p1472_p0 = scmp.ge.s32.totalorder %s1719_s25, 1  ;;  %s1719_s25 = sphi %s1804_s25, %s23_s25  }
   0x2   : > { %p386_p1 = scmp.lt.s32.totalorder %s1719_s25, 3 }
   0x4   : > { %p387_p2 = pnand %p1472_p0, %p386_p1 }
   0x5   : > { %p428_p3 = scmp.lt.s32.totalorder (!%p387_p2), %s1468_s26, 1  ;;  %s1723_s20 = smov (!%p387_p2), 64  }
   0x6   : > { %390 = sbr.rel (%p387_p2) target bundleno = 4036 (0xfc4), region = 72  ;;  %s1724_s21 = smov (!%p387_p2), 96  }
   0x7   : > { %s1725_s22 = smov (!%p387_p2), 88   ;;  %s1726_s23 = smov (!%p387_p2), 120  }
   0x8   : > { %s1727_s24 = smov (!%p387_p2), 56   ;;  %s1728_s27 = smov (!%p387_p2), 80  }
   0x9   : > { %s1729_s28 = smov (!%p387_p2), 112   ;;  %s1730_s16 = smov (!%p387_p2), 48  }
   0xa   : > { %s1732_s18 = smov (!%p387_p2), 104  }
   0xb   : > { %v1679_v0 = vld [vmem:[%s2033_s1 + $0x8] sm:$0xff]   ;;  %v1721_v1 = vmov 0.0   ;;  %v1680_v2 = vld [vmem:[%s2033_s1] sm:$0xff]   ;;  %vm1722_vm0 = vmmov 0   ;;  %s2047_s26 = smov (!%p428_p3, %s1468_s26), 1  ;;  %vm462_vm1 = vcmask 261120   ;;  %v506_v16 = vlaneseq }
   0xc   : > { %1550 = vmatprep.subr.bf16.mxu1 %v1721_v1  ;;  %1576 = vmatprep.subr.bf16.mxu0 %v1721_v1  ;;  %s1473_s14 = sshll.u32 %s2047_s26, 3  ;;  %v1475_v5 = vld [vmem:[%s2034_s2] ss:$0 sm:$0xff]  ;;  %vm519_vm2 = vcmask 64512   ;;  %vm585_vm3 = vcmask 1043456   ;;  %s1474_s30 = sshll.u32 %s2047_s26, 2 }
   0xd   : > { %1551 = vmatpush3.bf16.msra.mxu1 %v1679_v0  ;;  %1554 = vmatprep.mubr.msk.bf16.mxu1 %vm1722_vm0, %v1721_v1  ;;  %s431_s17 = scalar_lea.vmem %s2032_s0, %s1473_s14  ;;  %v1854_v17 = vshrl.u32 %v506_v16, 7  ;;  %v1856_v18 = vand.u32 127, %v506_v16  ;;  %v512_v54 = vld [vmem:[%s2035_s3 + $0x4] sm:$0xf]  ;;  %v511_v60 = vld [vmem:[%s2035_s3] sm:$0xf] }
   0xe   : > { %1552 = vmatprep.subr.bf16.mxu1 %v1721_v1  ;;  %1578 = vmatprep.mubr.msk.bf16.mxu0 %vm1722_vm0, %v1721_v1  ;;  %v1832_v3 = vld [vmem:[%s431_s17] sm:$0xff]  ;;  %v747_v55 = vsel %vm585_vm3, %v512_v54, 0  ;;  %v793_v63 = vsel %vm585_vm3, %v511_v60, 0  ;;  %s1731_s17 = smov 72   ;;  %vm1413_vm5 = vcmask 257024  }
   0xf   : > { %v438_v4 = vpack.c.bf16 %v1832_v3, %v1832_v3  ;;  %vm510_vm4 = vcmp.le.s32.totalorder %v1856_v18, %v1854_v17 }
  0x11   : > { %1553 = vmatpush3.bf16.msra.mxu1 %v1680_v2 }
  0x12   : > { %1558 = vmatprep.subr.bf16.mxu1 %v1721_v1 }
  0x14   : > { %1555 = vmatmul.mubr.msk.bf16.vlgmr.msra.gmra.mxu1 %vm462_vm1, %v438_v4 }
  0x15   : > { %1560 = vmatprep.mubr.msk.bf16.mxu1 %vm1722_vm0, %v1721_v1 }
  0xd4   : > { %v500_v6 = vpop.f32.mrf.mxu1 }
  0xd5   : > { %v501_v7 = vadd.f32 %v1475_v5, %v500_v6 }
  0xd6   : > { %v1556_v8 = vpop.f32.mrf.mxu1 }
  0xd7   : > { %v1842_v9 = vpack.c.bf16 %v501_v7, %v501_v7 }
  0xd8   : > { %v503_v10 = vpop.f32.mrf.mxu1 }
  0xd9   : > { %580 = vrot.lane.b32.xlu1 %v1842_v9, %s1723_s20  ;;  %517 = vrot.lane.b32.xlu0 %v1842_v9, %s1724_s21  ;;  %s1733_s21 = smov 40  }
  0xda   : > { %v1557_v11 = vpop.f32.mrf.mxu1 }
 0x14b   : > { %v518_v12 = vpop.permute.xlu0 %517  ;;  %v581_v14 = vpop.permute.xlu1 %580 }
 0x14c   : > { %v524_v13 = vsel %vm519_vm2, %v518_v12, 0  ;;  %v587_v15 = vsel %vm585_vm3, %v581_v14, 0 }
 0x14d   : > { %1559 = vmatpush3.bf16.xpose.msra.mxu1 %v524_v13 }
 0x14e   : > { %1564 = vmatprep.subr.bf16.mxu1 %v1721_v1 }
 0x154   : > { %1561 = vmatmul.mubr.msk.bf16.vlgmr.msra.gmra.mxu1 %vm519_vm2, %v1842_v9 }
 0x155   : > { %1565 = vmatpush3.bf16.msra.mxu1 %v587_v15  ;;  %1566 = vmatprep.mubr.msk.bf16.mxu1 %vm1722_vm0, %v1721_v1 }
 0x156   : > { %1570 = vmatprep.subr.bf16.mxu1 %v1721_v1 }
 0x214   : > { %v560_v19 = vpop.f32.mrf.mxu1 }
 0x215   : > { %v566_v20 = vmul.f32 0.35355338, %v560_v19 }
 0x216   : > { %v1562_v21 = vpop.f32.mrf.mxu1 }
 0x217   : > { %v567_v22 = vsel %vm510_vm4, %v566_v20, -1e+09 }
 0x218   : > { %v563_v23 = vpop.f32.mrf.mxu1  ;;  %v568_v24 = vsel %vm519_vm2, %v567_v22, -inf }
 0x219   : > { %569 = vmax.xlane.f32.xlu0 %v568_v24 }
 0x21a   : > { %v1563_v25 = vpop.f32.mrf.mxu1 }
 0x2a2   : > { %v570_v26 = vpop.xlane.xlu0 %569 }
 0x2a3   : > { %v571_v27 = vsub.f32 %v567_v22, %v570_v26 }
 0x2a5   : > { %v572_v28 = vmul.f32 1.442695, %v571_v27 }
 0x2a7   : > { %1691 = vpow2.f32 %v572_v28 }
 0x2b4   : > { %v1692_v29 = vpop.eup %1691 }
 0x2b5   : > { %v574_v30 = vsel %vm519_vm2, %v1692_v29, 0.0 }
 0x2b6   : > { %575 = vadd.xlane.f32.xlu1 %v574_v30 }
 0x2c7   : > { %632 = vrot.lane.b32.xlu1 %v1842_v9, %s1725_s22 }
 0x2cb   : > { %630 = vrot.lane.b32.xlu1 %v1842_v9, %s1726_s23 }
 0x33f   : > { %v576_v31 = vpop.xlane.xlu1 %575 }
 0x340   : > { %1693 = vrcp.f32 %v576_v31 }
 0x343   : > { %v633_v34 = vpop.permute.xlu1 %632 }
 0x344   : > { %v638_v36 = vsel %vm519_vm2, %v633_v34, 0 }
 0x347   : > { %v631_v37 = vpop.permute.xlu1 %630 }
 0x34d   : > { %v1694_v32 = vpop.eup %1693 }
 0x34e   : > { %v578_v33 = vmul.f32 %v1694_v32, %v1692_v29 }
 0x350   : > { %v579_v35 = vpack.c.bf16 %v578_v33, %v578_v33 }
 0x352   : > { %1567 = vmatmul.mubr.msk.bf16.vlgmr.msra.gmra.mxu1 %vm519_vm2, %v579_v35 }
 0x353   : > { %1571 = vmatpush3.bf16.xpose.msra.mxu1 %v638_v36  ;;  %1572 = vmatprep.mubr.msk.bf16.mxu1 %vm1722_vm0, %v1721_v1 }
 0x354   : > { %1582 = vmatprep.subr.bf16.mxu1 %v1721_v1 }
 0x35a   : > { %1573 = vmatmul.mubr.msk.bf16.vlgmr.msra.gmra.mxu1 %vm519_vm2, %v631_v37 }
 0x35b   : > { %1584 = vmatprep.mubr.msk.bf16.mxu1 %vm1722_vm0, %v1721_v1  ;;  %1583 = vmatpush3.bf16.msra.mxu1 %v747_v55 }
 0x35c   : > { %1594 = vmatprep.subr.bf16.mxu1 %v1721_v1 }
 0x412   : > { %v623_v38 = vpop.f32.mrf.mxu1 }
 0x413   : > { %v629_v0 = vpack.c.bf16 %v623_v38, %v623_v38 }
 0x414   : > { %v1568_v39 = vpop.f32.mrf.mxu1 }
 0x416   : > { %v626_v40 = vpop.f32.mrf.mxu1 }
 0x418   : > { %v1569_v41 = vpop.f32.mrf.mxu1 }
 0x41a   : > { %v674_v42 = vpop.f32.mrf.mxu1 }
 0x41b   : > { %v680_v43 = vmul.f32 0.35355338, %v674_v42 }
 0x41c   : > { %v1574_v44 = vpop.f32.mrf.mxu1 }
 0x41d   : > { %v681_v45 = vsel %vm510_vm4, %v680_v43, -1e+09  ;;  %v513_v43 = vld [vmem:[%s2035_s3 + $0x8] sm:$0xf] }
 0x41e   : > { %v677_v46 = vpop.f32.mrf.mxu1  ;;  %v682_v47 = vsel %vm519_vm2, %v681_v45, -inf  ;;  %v952_v44 = vsel %vm585_vm3, %v513_v43, 0 }
 0x41f   : > { %683 = vmax.xlane.f32.xlu1 %v682_v47 }
 0x420   : > { %v1575_v48 = vpop.f32.mrf.mxu1 }
 0x4a8   : > { %v684_v49 = vpop.xlane.xlu1 %683 }
 0x4a9   : > { %v685_v50 = vsub.f32 %v681_v45, %v684_v49 }
 0x4ab   : > { %v686_v51 = vmul.f32 1.442695, %v685_v50 }
 0x4ad   : > { %1695 = vpow2.f32 %v686_v51 }
 0x4ba   : > { %v1696_v52 = vpop.eup %1695 }
 0x4bb   : > { %v688_v53 = vsel %vm519_vm2, %v1696_v52, 0.0 }
 0x4bc   : > { %689 = vadd.xlane.f32.xlu0 %v688_v53 }
 0x4d2   : > { %694 = vrot.lane.b32.xlu0 %v1842_v9, %s1727_s24 }
 0x4d6   : > { %837 = vrot.lane.b32.xlu0 %v1842_v9, %s1728_s27 }
 0x4da   : > { %835 = vrot.lane.b32.xlu0 %v1842_v9, %s1729_s28 }
 0x545   : > { %v690_v56 = vpop.xlane.xlu0 %689 }
 0x546   : > { %1697 = vrcp.f32 %v690_v56 }
 0x549   : > { %v695_v57 = vpop.permute.xlu0 %694 }
 0x54a   : > { %v700_v58 = vsel %vm585_vm3, %v695_v57, 0 }
 0x54b   : > { %1577 = vmatpush3.bf16.msra.mxu0 %v700_v58 }
 0x54c   : > { %1588 = vmatprep.subr.bf16.mxu0 %v1721_v1 }
 0x54d   : > { %v838_v2 = vpop.permute.xlu0 %837 }
 0x54e   : > { %v843_v7 = vsel %vm519_vm2, %v838_v2, 0 }
 0x551   : > { %v836_v12 = vpop.permute.xlu0 %835 }
 0x553   : > { %v1698_v59 = vpop.eup %1697 }
 0x554   : > { %v692_v61 = vmul.f32 %v1698_v59, %v1696_v52 }
 0x556   : > { %v693_v62 = vpack.c.bf16 %v692_v61, %v692_v61 }
 0x558   : > { %1579 = vmatmul.mubr.msk.bf16.vlgmr.msra.gmra.mxu0 %vm519_vm2, %v693_v62 }
 0x559   : > { %1589 = vmatpush3.bf16.msra.mxu0 %v793_v63  ;;  %1590 = vmatprep.mubr.msk.bf16.mxu0 %vm1722_vm0, %v1721_v1 }
 0x55a   : > { %1600 = vmatprep.subr.bf16.mxu0 %v1721_v1 }
 0x560   : > { %1591 = vmatmul.mubr.msk.bf16.vlgmr.msra.gmra.mxu0 %vm519_vm2, %v629_v0  ;;  %v514_v0 = vld [vmem:[%s2035_s3 + $0xc] sm:$0xf] }
 0x561   : > { %1602 = vmatprep.mubr.msk.bf16.mxu0 %vm1722_vm0, %v1721_v1 }
 0x618   : > { %v736_v4 = vpop.f32.mrf.mxu0 }
 0x619   : > { %v742_v5 = vpack.c.bf16 %v736_v4, %v736_v4  ;;  %v1112_v4 = vsel %vm585_vm3, %v514_v0, 0 }
 0x61a   : > { %v1580_v6 = vpop.f32.mrf.mxu0 }
 0x61b   : > { %1585 = vmatmul.mubr.msk.bf16.vlgmr.msra.gmra.mxu1 %vm519_vm2, %v742_v5 }
 0x61c   : > { %1595 = vmatpush3.bf16.xpose.msra.mxu1 %v843_v7  ;;  %v739_v8 = vpop.f32.mrf.mxu0  ;;  %1596 = vmatprep.mubr.msk.bf16.mxu1 %vm1722_vm0, %v1721_v1 }
 0x61d   : > { %1606 = vmatprep.subr.bf16.mxu1 %v1721_v1 }
 0x61e   : > { %v1581_v10 = vpop.f32.mrf.mxu0 }
 0x620   : > { %v1906_v11 = vpop.f32.mrf.mxu0 }
 0x622   : > { %v1592_v13 = vpop.f32.mrf.mxu0 }
 0x623   : > { %1597 = vmatmul.mubr.msk.bf16.vlgmr.msra.gmra.mxu1 %vm519_vm2, %v836_v12 }
 0x624   : > { %v832_v14 = vpop.f32.mrf.mxu0  ;;  %1608 = vmatprep.mubr.msk.bf16.mxu1 %vm1722_vm0, %v1721_v1  ;;  %1607 = vmatpush3.bf16.msra.mxu1 %v952_v44  ;;  %v1683_v44 = vld [vmem:[%s2041_s9 + $0x38] sm:$0xff]  }
 0x625   : > { %1618 = vmatprep.subr.bf16.mxu1 %v1721_v1 }
 0x626   : > { %v1593_v15 = vpop.f32.mrf.mxu0 }
 0x6db   : > { %v1911_v16 = vpop.f32.mrf.mxu1 }
 0x6dc   : > { %v830_v17 = vadd.f32 %v1906_v11, %v1911_v16 }
 0x6dd   : > { %v1586_v19 = vpop.f32.mrf.mxu1 }
 0x6df   : > { %v786_v20 = vpop.f32.mrf.mxu1 }
 0x6e0   : > { %v1491_v20 = vld [vmem:[%s2036_s4] ss:$0 sm:$0xff] }
 0x6e1   : > { %v1587_v21 = vpop.f32.mrf.mxu1 }
 0x6e3   : > { %v879_v22 = vpop.f32.mrf.mxu1 }
 0x6e4   : > { %v885_v23 = vmul.f32 0.35355338, %v879_v22 }
 0x6e5   : > { %v1598_v24 = vpop.f32.mrf.mxu1 }
 0x6e6   : > { %v886_v25 = vsel %vm510_vm4, %v885_v23, -1e+09 }
 0x6e7   : > { %v882_v26 = vpop.f32.mrf.mxu1  ;;  %v887_v27 = vsel %vm519_vm2, %v886_v25, -inf }
 0x6e8   : > { %888 = vmax.xlane.f32.xlu1 %v887_v27 }
 0x6e9   : > { %v1599_v28 = vpop.f32.mrf.mxu1 }
 0x6f9   : > { %899 = vrot.lane.b32.xlu1 %v1842_v9, %s1730_s16  ;;  %s435_s16 = scalar_lea.vmem %s2045_s13, %s1474_s30 }
 0x6fd   : > { %997 = vrot.lane.b32.xlu1 %v1842_v9, %s1731_s17 }
 0x701   : > { %995 = vrot.lane.b32.xlu1 %v1842_v9, %s1732_s18 }
 0x771   : > { %v889_v29 = vpop.xlane.xlu1 %888 }
 0x772   : > { %v890_v30 = vsub.f32 %v886_v25, %v889_v29 }
 0x774   : > { %v891_v31 = vmul.f32 1.442695, %v890_v30 }
 0x775   : > { %v900_v32 = vpop.permute.xlu1 %899 }
 0x776   : > { %1699 = vpow2.f32 %v891_v31  ;;  %v905_v33 = vsel %vm585_vm3, %v900_v32, 0 }
 0x777   : > { %1601 = vmatpush3.bf16.msra.mxu0 %v905_v33  ;;  %v1681_v33 = vld [vmem:[%s2039_s7 + $0x8] sm:$0xff]  }
 0x778   : > { %1612 = vmatprep.subr.bf16.mxu0 %v1721_v1 }
 0x779   : > { %v998_v39 = vpop.permute.xlu1 %997 }
 0x77a   : > { %v1003_v41 = vsel %vm519_vm2, %v998_v39, 0 }
 0x77d   : > { %v996_v42 = vpop.permute.xlu1 %995 }
 0x783   : > { %v1700_v34 = vpop.eup %1699 }
 0x784   : > { %v893_v35 = vsel %vm519_vm2, %v1700_v34, 0.0 }
 0x785   : > { %894 = vadd.xlane.f32.xlu0 %v893_v35 }
 0x80e   : > { %v895_v36 = vpop.xlane.xlu0 %894 }
 0x80f   : > { %1701 = vrcp.f32 %v895_v36 }
 0x81c   : > { %v1702_v37 = vpop.eup %1701 }
 0x81d   : > { %v897_v38 = vmul.f32 %v1702_v37, %v1700_v34 }
 0x81f   : > { %v898_v40 = vpack.c.bf16 %v897_v38, %v897_v38  ;;  %v1492_v38 = vld [vmem:[%s2037_s5] ss:$0 sm:$0xff] }
 0x821   : > { %1603 = vmatmul.mubr.msk.bf16.vlgmr.msra.gmra.mxu0 %vm519_vm2, %v898_v40  ;;  %v1493_v40 = vld [vmem:[%s2038_s6] ss:$0 sm:$0xff] }
 0x822   : > { %1613 = vmatpush3.bf16.xpose.msra.mxu0 %v1003_v41  ;;  %1614 = vmatprep.mubr.msk.bf16.mxu0 %vm1722_vm0, %v1721_v1 }
 0x823   : > { %1624 = vmatprep.subr.bf16.mxu0 %v1721_v1 }
 0x829   : > { %1615 = vmatmul.mubr.msk.bf16.vlgmr.msra.gmra.mxu0 %vm519_vm2, %v996_v42 }
 0x82a   : > { %1626 = vmatprep.mubr.msk.bf16.mxu0 %vm1722_vm0, %v1721_v1  ;;  %1625 = vmatpush3.bf16.msra.mxu0 %v1112_v4 }
 0x82b   : > { %1638 = vmatprep.subr.bf16.mxu0 %v1721_v1 }
 0x8e1   : > { %v941_v45 = vpop.f32.mrf.mxu0 }
 0x8e2   : > { %v947_v46 = vpack.c.bf16 %v941_v45, %v941_v45  ;;  %v1684_v45 = vld [vmem:[%s2041_s9 + $0x30] sm:$0xff]  }
 0x8e3   : > { %v1604_v47 = vpop.f32.mrf.mxu0 }
 0x8e4   : > { %1609 = vmatmul.mubr.msk.bf16.vlgmr.msra.gmra.mxu1 %vm519_vm2, %v947_v46  ;;  %v1685_v46 = vld [vmem:[%s2041_s9 + $0x28] sm:$0xff]   ;;  %v1686_v47 = vld [vmem:[%s2041_s9 + $0x20] sm:$0xff]  }
 0x8e5   : > { %v944_v48 = vpop.f32.mrf.mxu0  ;;  %1620 = vmatprep.mubr.msk.bf16.mxu1 %vm1722_vm0, %v1721_v1 }
 0x8e6   : > { %v1687_v48 = vld [vmem:[%s2041_s9 + $0x18] sm:$0xff]  }
 0x8e7   : > { %v1605_v49 = vpop.f32.mrf.mxu0 }
 0x8e8   : > { %v1688_v49 = vld [vmem:[%s2041_s9 + $0x10] sm:$0xff]  }
 0x8e9   : > { %v1039_v50 = vpop.f32.mrf.mxu0 }
 0x8ea   : > { %v1045_v51 = vmul.f32 0.35355338, %v1039_v50  ;;  %v1689_v50 = vld [vmem:[%s2041_s9 + $0x8] sm:$0xff]  }
 0x8eb   : > { %v1616_v52 = vpop.f32.mrf.mxu0 }
 0x8ec   : > { %v1046_v53 = vsel %vm510_vm4, %v1045_v51, -1e+09  ;;  %v1690_v51 = vld [vmem:[%s2041_s9] sm:$0xff]  }
 0x8ed   : > { %v1042_v54 = vpop.f32.mrf.mxu0  ;;  %v1047_v55 = vsel %vm519_vm2, %v1046_v53, -inf  ;;  %v1494_v52 = vld [vmem:[%s2040_s8] ss:$0 sm:$0xff] }
 0x8ee   : > { %1048 = vmax.xlane.f32.xlu1 %v1047_v55 }
 0x8ef   : > { %v1617_v56 = vpop.f32.mrf.mxu0 }
 0x977   : > { %v1049_v57 = vpop.xlane.xlu1 %1048 }
 0x978   : > { %v1050_v58 = vsub.f32 %v1046_v53, %v1049_v57 }
 0x97a   : > { %v1051_v59 = vmul.f32 1.442695, %v1050_v58 }
 0x97c   : > { %1703 = vpow2.f32 %v1051_v59 }
 0x989   : > { %v1704_v60 = vpop.eup %1703 }
 0x98a   : > { %v1053_v61 = vsel %vm519_vm2, %v1704_v60, 0.0 }
 0x98b   : > { %1054 = vadd.xlane.f32.xlu0 %v1053_v61 }
 0x9a1   : > { %1059 = vrot.lane.b32.xlu0 %v1842_v9, %s1733_s21 }
 0x9a4   : > { %v988_v18 = vpop.f32.mrf.mxu1 }
 0x9a5   : > { %v994_v62 = vadd.f32 %v988_v18, %v830_v17 }
 0x9a6   : > { %v1610_v63 = vpop.f32.mrf.mxu1 }
 0x9a8   : > { %v991_v2 = vpop.f32.mrf.mxu1 }
 0x9a9   : > { %v1498_v2 = vld [vmem:[%s2042_s10] ss:$0 sm:$0xff] }
 0x9aa   : > { %v1611_v5 = vpop.f32.mrf.mxu1 }
 0xa14   : > { %v1055_v6 = vpop.xlane.xlu0 %1054 }
 0xa15   : > { %1705 = vrcp.f32 %v1055_v6 }
 0xa18   : > { %v1060_v9 = vpop.permute.xlu0 %1059 }
 0xa19   : > { %v1065_v7 = vsel %vm585_vm3, %v1060_v9, 0 }
 0xa1a   : > { %1619 = vmatpush3.bf16.msra.mxu1 %v1065_v7 }
 0xa1b   : > { %1630 = vmatprep.subr.bf16.mxu1 %v1721_v1 }
 0xa22   : > { %v1706_v8 = vpop.eup %1705 }
 0xa23   : > { %v1057_v10 = vmul.f32 %v1706_v8, %v1704_v60 }
 0xa25   : > { %v1058_v11 = vpack.c.bf16 %v1057_v10, %v1057_v10 }
 0xa27   : > { %1621 = vmatmul.mubr.msk.bf16.vlgmr.msra.gmra.mxu1 %vm519_vm2, %v1058_v11 }
 0xa28   : > { %1634 = vmatprep.mubr.msk.bf16.mxu1 %vm1722_vm0, %v1721_v1  ;;  %1631 = vmatpush3.bf16.msra.mxu1 %v1681_v33 }
 0xa29   : > { %1632 = vmatprep.subr.bf16.mxu1 %v1721_v1 }
 0xae7   : > { %v1101_v12 = vpop.f32.mrf.mxu1 }
 0xae8   : > { %v1107_v13 = vpack.c.bf16 %v1101_v12, %v1101_v12 }
 0xae9   : > { %v1622_v14 = vpop.f32.mrf.mxu1 }
 0xaea   : > { %1627 = vmatmul.mubr.msk.bf16.vlgmr.msra.gmra.mxu0 %vm519_vm2, %v1107_v13 }
 0xaeb   : > { %v1104_v15 = vpop.f32.mrf.mxu1  ;;  %1654 = vmatprep.mubr.msk.bf16.mxu0 %vm1722_vm0, %v1721_v1  ;;  %1639 = vmatpush3.bf16.msra.mxu0 %v1683_v44 }
 0xaec   : > { %1640 = vmatprep.subr.bf16.mxu0 %v1721_v1 }
 0xaed   : > { %v1623_v16 = vpop.f32.mrf.mxu1 }
 0xaef   : > { %1641 = vmatpush3.bf16.msra.mxu0 %v1684_v45 }
 0xaf0   : > { %1642 = vmatprep.subr.bf16.mxu0 %v1721_v1 }
 0xaf3   : > { %1643 = vmatpush3.bf16.msra.mxu0 %v1685_v46 }
 0xaf4   : > { %1644 = vmatprep.subr.bf16.mxu0 %v1721_v1 }
 0xaf7   : > { %1645 = vmatpush3.bf16.msra.mxu0 %v1686_v47 }
 0xaf8   : > { %1646 = vmatprep.subr.bf16.mxu0 %v1721_v1 }
 0xafb   : > { %1647 = vmatpush3.bf16.msra.mxu0 %v1687_v48 }
 0xafc   : > { %1648 = vmatprep.subr.bf16.mxu0 %v1721_v1 }
 0xaff   : > { %1649 = vmatpush3.bf16.msra.mxu0 %v1688_v49 }
 0xb00   : > { %1650 = vmatprep.subr.bf16.mxu0 %v1721_v1 }
 0xb03   : > { %1651 = vmatpush3.bf16.msra.mxu0 %v1689_v50 }
 0xb04   : > { %1652 = vmatprep.subr.bf16.mxu0 %v1721_v1 }
 0xb07   : > { %1653 = vmatpush3.bf16.msra.mxu0 %v1690_v51 }
 0xbaa   : > { %v1148_v19 = vpop.f32.mrf.mxu0 }
 0xbab   : > { %v1154_v21 = vadd.f32 %v1148_v19, %v994_v62 }
 0xbac   : > { %v1628_v22 = vpop.f32.mrf.mxu0 }
 0xbad   : > { %v1162_v23 = vadd.f32 %v1491_v20, %v1154_v21  ;;  %v1507_v22 = vld [vmem:[%s2043_s11] ss:$0 sm:$0xff] }
 0xbae   : > { %v1151_v24 = vpop.f32.mrf.mxu0 }
 0xbaf   : > { %v1163_v25 = vadd.f32 %v1162_v23, %v1832_v3  ;;  %v1682_v3 = vld [vmem:[%s2039_s7] sm:$0xff]  }
 0xbb0   : > { %v1629_v26 = vpop.f32.mrf.mxu0  ;;  %1633 = vmatpush3.bf16.msra.mxu1 %v1682_v3  ;;  %v1508_v24 = vld [vmem:[%s2044_s12] ss:$0 sm:$0xff] }
 0xbb1   : > { %v1166_v27 = vsel %vm462_vm1, %v1163_v25, 0.0 }
 0xbb2   : > { %1167 = vadd.xlane.f32.xlu0 %v1166_v27 }
 0xc3b   : > { %v1168_v28 = vpop.xlane.xlu0 %1167 }
 0xc3c   : > { %v1170_v29 = vmul.f32 0.03125, %v1168_v28 }
 0xc3e   : > { %v1171_v30 = vsub.f32 %v1163_v25, %v1170_v29 }
 0xc40   : > { %v1172_v31 = vmul.f32 %v1171_v30, %v1171_v30 }
 0xc42   : > { %v1173_v32 = vsel %vm462_vm1, %v1172_v31, 0.0 }
 0xc43   : > { %1174 = vadd.xlane.f32.xlu1 %v1173_v32 }
 0xccc   : > { %v1175_v34 = vpop.xlane.xlu1 %1174 }
 0xccd   : > { %v1176_v35 = vmul.f32 0.03125, %v1175_v34 }
 0xccf   : > { %v1177_v36 = vadd.f32 1e-05, %v1176_v35 }
 0xcd1   : > { %1707 = vrsqrt.f32 %v1177_v36 }
 0xcde   : > { %v1708_v37 = vpop.eup %1707 }
 0xcdf   : > { %v1179_v39 = vmul.f32 %v1708_v37, %v1171_v30 }
 0xce1   : > { %v1186_v41 = vmul.f32 %v1492_v38, %v1179_v39 }
 0xce3   : > { %v1193_v42 = vadd.f32 %v1493_v40, %v1186_v41 }
 0xce5   : > { %v1194_v43 = vpack.c.bf16 %v1193_v42, %v1193_v42 }
 0xce7   : > { %1635 = vmatmul.mubr.msk.bf16.vlgmr.msra.gmra.mxu1 %vm462_vm1, %v1194_v43 }
 0xda7   : > { %v1255_v53 = vpop.f32.mrf.mxu1 }
 0xda8   : > { %v1256_v54 = vadd.f32 %v1494_v52, %v1255_v53 }
 0xda9   : > { %v1636_v55 = vpop.f32.mrf.mxu1 }
 0xdaa   : > { %v1262_v56 = vmul.f32 0.044715, %v1256_v54  ;;  %v1261_v62 = vmul.f32 0.5, %v1256_v54 }
 0xdab   : > { %v1258_v57 = vpop.f32.mrf.mxu1 }
 0xdac   : > { %v1263_v58 = vmul.f32 %v1262_v56, %v1256_v54 }
 0xdad   : > { %v1637_v59 = vpop.f32.mrf.mxu1 }
 0xdae   : > { %v1264_v60 = vmul.f32 %v1263_v58, %v1256_v54 }
 0xdb0   : > { %v1265_v61 = vadd.f32 %v1264_v60, %v1256_v54 }
 0xdb2   : > { %v1266_v17 = vmul.f32 0.7978846, %v1265_v61 }
 0xdb4   : > { %1709 = vtanh.f32 %v1266_v17 }
 0xdc1   : > { %v1710_v18 = vpop.eup %1709 }
 0xdc2   : > { %v1268_v63 = vadd.f32 1.0, %v1710_v18 }
 0xdc4   : > { %v1269_v1 = vmul.f32 %v1268_v63, %v1261_v62 }
 0xdc6   : > { %v1270_v0 = vpack.c.bf16 %v1269_v1, %v1269_v1 }
 0xdc8   : > { %1655 = vmatmul.mubr.bf16.vlgmr.msra.gmra.mxu0 %v1270_v0 }
 0xe88   : > { %v1376_v4 = vpop.f32.mrf.mxu0 }
 0xe89   : > { %v1377_v5 = vadd.f32 %v1498_v2, %v1376_v4 }
 0xe8a   : > { %v1656_v6 = vpop.f32.mrf.mxu0 }
 0xe8b   : > { %v1382_v9 = vadd.f32 %v1377_v5, %v1193_v42 }
 0xe8c   : > { %v1379_v7 = vpop.f32.mrf.mxu0 }
 0xe8d   : > { %v1385_v8 = vsel %vm462_vm1, %v1382_v9, 0.0 }
 0xe8e   : > { %1386 = vadd.xlane.f32.xlu1 %v1385_v8  ;;  %v1657_v10 = vpop.f32.mrf.mxu0 }
 0xf17   : > { %v1387_v11 = vpop.xlane.xlu1 %1386 }
 0xf18   : > { %v1388_v12 = vmul.f32 0.03125, %v1387_v11 }
 0xf1a   : > { %v1389_v13 = vsub.f32 %v1382_v9, %v1388_v12 }
 0xf1c   : > { %v1390_v14 = vmul.f32 %v1389_v13, %v1389_v13 }
 0xf1e   : > { %v1391_v15 = vsel %vm462_vm1, %v1390_v14, 0.0 }
 0xf1f   : > { %1392 = vadd.xlane.f32.xlu1 %v1391_v15 }
 0xfa8   : > { %v1393_v16 = vpop.xlane.xlu1 %1392 }
 0xfa9   : > { %v1394_v19 = vmul.f32 0.03125, %v1393_v16 }
 0xfab   : > { %v1395_v20 = vadd.f32 1e-05, %v1394_v19 }
 0xfad   : > { %1711 = vrsqrt.f32 %v1395_v20 }
 0xfba   : > { %v1712_v21 = vpop.eup %1711 }
 0xfbb   : > { %v1397_v23 = vmul.f32 %v1712_v21, %v1389_v13 }
 0xfbd   : > { %v1404_v25 = vmul.f32 %v1507_v22, %v1397_v23 }
 0xfbf   : > { %v1411_v26 = vadd.f32 %v1508_v24, %v1404_v25 }
 0xfc1   : > { %v1412_v27 = vpack.c.bf16 %v1411_v26, %v1411_v26 }
 0xfc3   : > { %1414 = vst.msk [vmem:[%s435_s16] sm:$0xf] %vm1413_vm5, %v1412_v27 }
 0xfc4 PF: > { %s23_s25 = sadd.s32 1, %s1719_s25  }
 0xfc5   : > { %p20_p4 = scmp.ge.s32.totalorder %s23_s25, 4  }
 0xfc7   :  { %22 = sbr.rel (!%p20_p4) target bundleno = 1 (0x1), region = 102 }

// kernel: model_forward.3
= control target key start
LH: loop header
LB: loop body
LE: loop exit
PB: predicated region body
PF: predicated region fallthrough
CT: control target
= control target key end

     0   :  { %s1804_s25 = smov 0   ;;  %s2034_s0 = inlined_call_operand.vmem [shape: bf16[2,8,32], index: 0, kind: input, shape index: {}]   ;;  %s2035_s1 = inlined_call_operand.vmem [shape: bf16[32,96], index: 1, kind: input, shape index: {}]   ;;  %s2036_s2 = inlined_call_operand.vmem [shape: f32[1,96], index: 2, kind: input, shape index: {}]   ;;  %s2037_s3 = inlined_call_operand.vmem [shape: bf16[32,32], index: 3, kind: input, shape index: {}]   ;;  %s2038_s4 = inlined_call_operand.vmem [shape: f32[1,32], index: 4, kind: input, shape index: {}]   ;;  %s2039_s5 = inlined_call_operand.vmem [shape: f32[1,32], index: 5, kind: input, shape index: {}]   ;;  %s2040_s6 = inlined_call_operand.vmem [shape: f32[1,32], index: 6, kind: input, shape index: {}]   ;;  %s2041_s7 = inlined_call_operand.vmem [shape: bf16[32,128], index: 7, kind: input, shape index: {}]   ;;  %s2042_s8 = inlined_call_operand.vmem [shape: f32[1,128], index: 8, kind: input, shape index: {}]   ;;  %s2043_s9 = inlined_call_operand.vmem [shape: bf16[128,32], index: 9, kind: input, shape index: {}]   ;;  %s2044_s10 = inlined_call_operand.vmem [shape: f32[1,32], index: 10, kind: input, shape index: {}]   ;;  %s2045_s11 = inlined_call_operand.vmem [shape: f32[1,32], index: 11, kind: input, shape index: {}]   ;;  %s2046_s12 = inlined_call_operand.vmem [shape: f32[1,32], index: 12, kind: input, shape index: {}]   ;;  %s2047_s13 = inlined_call_operand.vmem [shape: bf16[2,8,32], index: 13, kind: output, shape index: {}]  }
   0x1 LB: > { %s1468_s26 = sadd.s32 4294967295, %s1719_s25   ;;  %p1472_p0 = scmp.ge.s32.totalorder %s1719_s25, 1  ;;  %s1719_s25 = sphi %s1804_s25, %s23_s25  }
   0x2   : > { %p386_p1 = scmp.lt.s32.totalorder %s1719_s25, 3 }
   0x4   : > { %p387_p2 = pnand %p1472_p0, %p386_p1 }
   0x5   : > { %p428_p3 = scmp.lt.s32.totalorder (!%p387_p2), %s1468_s26, 1  ;;  %s1723_s20 = smov (!%p387_p2), 64  }
   0x6   : > { %390 = sbr.rel (%p387_p2) target bundleno = 4036 (0xfc4), region = 72  ;;  %s1724_s21 = smov (!%p387_p2), 96  }
   0x7   : > { %s1725_s22 = smov (!%p387_p2), 88   ;;  %s1726_s23 = smov (!%p387_p2), 120  }
   0x8   : > { %s1727_s24 = smov (!%p387_p2), 56   ;;  %s1728_s27 = smov (!%p387_p2), 80  }
   0x9   : > { %s1729_s28 = smov (!%p387_p2), 112   ;;  %s1731_s18 = smov (!%p387_p2), 72  }
   0xa   : > { %s1732_s19 = smov (!%p387_p2), 104  }
   0xb   : > { %v1679_v0 = vld [vmem:[%s2035_s1 + $0x8] sm:$0xff]   ;;  %v1721_v1 = vmov 0.0   ;;  %v1680_v2 = vld [vmem:[%s2035_s1] sm:$0xff]   ;;  %vm1722_vm0 = vmmov 0   ;;  %s2049_s26 = smov (!%p428_p3, %s1468_s26), 1  ;;  %vm462_vm1 = vcmask 261120   ;;  %v506_v15 = vlaneseq }
   0xc   : > { %1550 = vmatprep.subr.bf16.mxu1 %v1721_v1  ;;  %1576 = vmatprep.subr.bf16.mxu0 %v1721_v1  ;;  %s1473_s14 = sshll.u32 %s2049_s26, 2  ;;  %v1475_v4 = vld [vmem:[%s2036_s2] ss:$0 sm:$0xff]  ;;  %vm519_vm2 = vcmask 64512   ;;  %vm585_vm3 = vcmask 1043456   ;;  %vm1413_vm5 = vcmask 257024  }
   0xd   : > { %1551 = vmatpush3.bf16.msra.mxu1 %v1679_v0  ;;  %1554 = vmatprep.mubr.msk.bf16.mxu1 %vm1722_vm0, %v1721_v1  ;;  %s431_s17 = scalar_lea.vmem %s2034_s0, %s1473_s14  ;;  %v1855_v16 = vshrl.u32 %v506_v15, 7  ;;  %v1857_v17 = vand.u32 127, %v506_v15  ;;  %v512_v53 = vld [vmem:[%s2037_s3 + $0x4] sm:$0xf]  ;;  %v511_v59 = vld [vmem:[%s2037_s3] sm:$0xf] }
   0xe   : > { %1552 = vmatprep.subr.bf16.mxu1 %v1721_v1  ;;  %1578 = vmatprep.mubr.msk.bf16.mxu0 %vm1722_vm0, %v1721_v1  ;;  %v1834_v3 = vld [vmem:[%s431_s17] sm:$0xf]  ;;  %v747_v54 = vsel %vm585_vm3, %v512_v53, 0  ;;  %v793_v62 = vsel %vm585_vm3, %v511_v59, 0  ;;  %s1730_s17 = smov 48  }
   0xf   : > { %vm510_vm4 = vcmp.le.s32.totalorder %v1857_v17, %v1855_v16 }
  0x11   : > { %1553 = vmatpush3.bf16.msra.mxu1 %v1680_v2 }
  0x12   : > { %1558 = vmatprep.subr.bf16.mxu1 %v1721_v1 }
  0x14   : > { %1555 = vmatmul.mubr.msk.bf16.vlgmr.msra.gmra.mxu1 %vm462_vm1, %v1834_v3 }
  0x15   : > { %1560 = vmatprep.mubr.msk.bf16.mxu1 %vm1722_vm0, %v1721_v1 }
  0xd4   : > { %v500_v5 = vpop.f32.mrf.mxu1 }
  0xd5   : > { %v501_v6 = vadd.f32 %v1475_v4, %v500_v5 }
  0xd6   : > { %v1556_v7 = vpop.f32.mrf.mxu1 }
  0xd7   : > { %v1843_v8 = vpack.c.bf16 %v501_v6, %v501_v6 }
  0xd8   : > { %v503_v9 = vpop.f32.mrf.mxu1 }
  0xd9   : > { %580 = vrot.lane.b32.xlu1 %v1843_v8, %s1723_s20  ;;  %517 = vrot.lane.b32.xlu0 %v1843_v8, %s1724_s21 }
  0xda   : > { %v1557_v10 = vpop.f32.mrf.mxu1 }
 0x14b   : > { %v518_v11 = vpop.permute.xlu0 %517  ;;  %v581_v13 = vpop.permute.xlu1 %580 }
 0x14c   : > { %v524_v12 = vsel %vm519_vm2, %v518_v11, 0  ;;  %v587_v14 = vsel %vm585_vm3, %v581_v13, 0 }
 0x14d   : > { %1559 = vmatpush3.bf16.xpose.msra.mxu1 %v524_v12 }
 0x14e   : > { %1564 = vmatprep.subr.bf16.mxu1 %v1721_v1 }
 0x154   : > { %1561 = vmatmul.mubr.msk.bf16.vlgmr.msra.gmra.mxu1 %vm519_vm2, %v1843_v8 }
 0x155   : > { %1565 = vmatpush3.bf16.msra.mxu1 %v587_v14  ;;  %1566 = vmatprep.mubr.msk.bf16.mxu1 %vm1722_vm0, %v1721_v1 }
 0x156   : > { %1570 = vmatprep.subr.bf16.mxu1 %v1721_v1 }
 0x214   : > { %v560_v18 = vpop.f32.mrf.mxu1 }
 0x215   : > { %v566_v19 = vmul.f32 0.35355338, %v560_v18 }
 0x216   : > { %v1562_v20 = vpop.f32.mrf.mxu1 }
 0x217   : > { %v567_v21 = vsel %vm510_vm4, %v566_v19, -1e+09 }
 0x218   : > { %v563_v22 = vpop.f32.mrf.mxu1  ;;  %v568_v23 = vsel %vm519_vm2, %v567_v21, -inf }
 0x219   : > { %569 = vmax.xlane.f32.xlu0 %v568_v23 }
 0x21a   : > { %v1563_v24 = vpop.f32.mrf.mxu1 }
 0x2a2   : > { %v570_v25 = vpop.xlane.xlu0 %569 }
 0x2a3   : > { %v571_v26 = vsub.f32 %v567_v21, %v570_v25 }
 0x2a5   : > { %v572_v27 = vmul.f32 1.442695, %v571_v26 }
 0x2a7   : > { %1691 = vpow2.f32 %v572_v27 }
 0x2b4   : > { %v1692_v28 = vpop.eup %1691 }
 0x2b5   : > { %v574_v29 = vsel %vm519_vm2, %v1692_v28, 0.0 }
 0x2b6   : > { %575 = vadd.xlane.f32.xlu1 %v574_v29 }
 0x2c7   : > { %632 = vrot.lane.b32.xlu1 %v1843_v8, %s1725_s22  ;;  %s1733_s22 = smov 40  }
 0x2cb   : > { %630 = vrot.lane.b32.xlu1 %v1843_v8, %s1726_s23 }
 0x33f   : > { %v576_v30 = vpop.xlane.xlu1 %575 }
 0x340   : > { %1693 = vrcp.f32 %v576_v30 }
 0x343   : > { %v633_v33 = vpop.permute.xlu1 %632 }
 0x344   : > { %v638_v35 = vsel %vm519_vm2, %v633_v33, 0 }
 0x347   : > { %v631_v36 = vpop.permute.xlu1 %630 }
 0x34d   : > { %v1694_v31 = vpop.eup %1693 }
 0x34e   : > { %v578_v32 = vmul.f32 %v1694_v31, %v1692_v28 }
 0x350   : > { %v579_v34 = vpack.c.bf16 %v578_v32, %v578_v32 }
 0x352   : > { %1567 = vmatmul.mubr.msk.bf16.vlgmr.msra.gmra.mxu1 %vm519_vm2, %v579_v34 }
 0x353   : > { %1571 = vmatpush3.bf16.xpose.msra.mxu1 %v638_v35  ;;  %1572 = vmatprep.mubr.msk.bf16.mxu1 %vm1722_vm0, %v1721_v1 }
 0x354   : > { %1582 = vmatprep.subr.bf16.mxu1 %v1721_v1 }
 0x35a   : > { %1573 = vmatmul.mubr.msk.bf16.vlgmr.msra.gmra.mxu1 %vm519_vm2, %v631_v36 }
 0x35b   : > { %1584 = vmatprep.mubr.msk.bf16.mxu1 %vm1722_vm0, %v1721_v1  ;;  %1583 = vmatpush3.bf16.msra.mxu1 %v747_v54 }
 0x35c   : > { %1594 = vmatprep.subr.bf16.mxu1 %v1721_v1 }
 0x412   : > { %v623_v37 = vpop.f32.mrf.mxu1 }
 0x413   : > { %v629_v63 = vpack.c.bf16 %v623_v37, %v623_v37 }
 0x414   : > { %v1568_v38 = vpop.f32.mrf.mxu1 }
 0x416   : > { %v626_v39 = vpop.f32.mrf.mxu1 }
 0x418   : > { %v1569_v40 = vpop.f32.mrf.mxu1 }
 0x41a   : > { %v674_v41 = vpop.f32.mrf.mxu1 }
 0x41b   : > { %v680_v42 = vmul.f32 0.35355338, %v674_v41 }
 0x41c   : > { %v1574_v43 = vpop.f32.mrf.mxu1 }
 0x41d   : > { %v681_v44 = vsel %vm510_vm4, %v680_v42, -1e+09  ;;  %v513_v42 = vld [vmem:[%s2037_s3 + $0x8] sm:$0xf] }
 0x41e   : > { %v677_v45 = vpop.f32.mrf.mxu1  ;;  %v682_v46 = vsel %vm519_vm2, %v681_v44, -inf  ;;  %v952_v43 = vsel %vm585_vm3, %v513_v42, 0 }
 0x41f   : > { %683 = vmax.xlane.f32.xlu1 %v682_v46 }
 0x420   : > { %v1575_v47 = vpop.f32.mrf.mxu1 }
 0x4a8   : > { %v684_v48 = vpop.xlane.xlu1 %683 }
 0x4a9   : > { %v685_v49 = vsub.f32 %v681_v44, %v684_v48 }
 0x4ab   : > { %v686_v50 = vmul.f32 1.442695, %v685_v49 }
 0x4ad   : > { %1695 = vpow2.f32 %v686_v50 }
 0x4ba   : > { %v1696_v51 = vpop.eup %1695 }
 0x4bb   : > { %v688_v52 = vsel %vm519_vm2, %v1696_v51, 0.0 }
 0x4bc   : > { %689 = vadd.xlane.f32.xlu0 %v688_v52 }
 0x4d2   : > { %694 = vrot.lane.b32.xlu0 %v1843_v8, %s1727_s24 }
 0x4d6   : > { %837 = vrot.lane.b32.xlu0 %v1843_v8, %s1728_s27 }
 0x4da   : > { %835 = vrot.lane.b32.xlu0 %v1843_v8, %s1729_s28 }
 0x545   : > { %v690_v55 = vpop.xlane.xlu0 %689 }
 0x546   : > { %1697 = vrcp.f32 %v690_v55 }
 0x549   : > { %v695_v56 = vpop.permute.xlu0 %694 }
 0x54a   : > { %v700_v57 = vsel %vm585_vm3, %v695_v56, 0 }
 0x54b   : > { %1577 = vmatpush3.bf16.msra.mxu0 %v700_v57 }
 0x54c   : > { %1588 = vmatprep.subr.bf16.mxu0 %v1721_v1 }
 0x54d   : > { %v838_v0 = vpop.permute.xlu0 %837 }
 0x54e   : > { %v843_v6 = vsel %vm519_vm2, %v838_v0, 0 }
 0x551   : > { %v836_v11 = vpop.permute.xlu0 %835 }
 0x553   : > { %v1698_v58 = vpop.eup %1697 }
 0x554   : > { %v692_v60 = vmul.f32 %v1698_v58, %v1696_v51 }
 0x556   : > { %v693_v61 = vpack.c.bf16 %v692_v60, %v692_v60 }
 0x558   : > { %1579 = vmatmul.mubr.msk.bf16.vlgmr.msra.gmra.mxu0 %vm519_vm2, %v693_v61 }
 0x559   : > { %1589 = vmatpush3.bf16.msra.mxu0 %v793_v62  ;;  %1590 = vmatprep.mubr.msk.bf16.mxu0 %vm1722_vm0, %v1721_v1 }
 0x55a   : > { %1600 = vmatprep.subr.bf16.mxu0 %v1721_v1 }
 0x560   : > { %1591 = vmatmul.mubr.msk.bf16.vlgmr.msra.gmra.mxu0 %vm519_vm2, %v629_v63  ;;  %v514_v63 = vld [vmem:[%s2037_s3 + $0xc] sm:$0xf] }
 0x561   : > { %1602 = vmatprep.mubr.msk.bf16.mxu0 %vm1722_vm0, %v1721_v1 }
 0x618   : > { %v736_v2 = vpop.f32.mrf.mxu0 }
 0x619   : > { %v742_v4 = vpack.c.bf16 %v736_v2, %v736_v2  ;;  %v1112_v2 = vsel %vm585_vm3, %v514_v63, 0 }
 0x61a   : > { %v1580_v5 = vpop.f32.mrf.mxu0 }
 0x61b   : > { %1585 = vmatmul.mubr.msk.bf16.vlgmr.msra.gmra.mxu1 %vm519_vm2, %v742_v4 }
 0x61c   : > { %1595 = vmatpush3.bf16.xpose.msra.mxu1 %v843_v6  ;;  %v739_v7 = vpop.f32.mrf.mxu0  ;;  %1596 = vmatprep.mubr.msk.bf16.mxu1 %vm1722_vm0, %v1721_v1 }
 0x61d   : > { %1606 = vmatprep.subr.bf16.mxu1 %v1721_v1 }
 0x61e   : > { %v1581_v9 = vpop.f32.mrf.mxu0 }
 0x620   : > { %v1907_v10 = vpop.f32.mrf.mxu0 }
 0x622   : > { %v1592_v12 = vpop.f32.mrf.mxu0 }
 0x623   : > { %1597 = vmatmul.mubr.msk.bf16.vlgmr.msra.gmra.mxu1 %vm519_vm2, %v836_v11 }
 0x624   : > { %v832_v13 = vpop.f32.mrf.mxu0  ;;  %1608 = vmatprep.mubr.msk.bf16.mxu1 %vm1722_vm0, %v1721_v1  ;;  %1607 = vmatpush3.bf16.msra.mxu1 %v952_v43 }
 0x625   : > { %1618 = vmatprep.subr.bf16.mxu1 %v1721_v1 }
 0x626   : > { %v1593_v14 = vpop.f32.mrf.mxu0 }
 0x6db   : > { %v1912_v15 = vpop.f32.mrf.mxu1 }
 0x6dc   : > { %v830_v16 = vadd.f32 %v1907_v10, %v1912_v15 }
 0x6dd   : > { %v1586_v18 = vpop.f32.mrf.mxu1 }
 0x6df   : > { %v786_v19 = vpop.f32.mrf.mxu1 }
 0x6e0   : > { %v1491_v19 = vld [vmem:[%s2038_s4] ss:$0 sm:$0xff] }
 0x6e1   : > { %v1587_v20 = vpop.f32.mrf.mxu1 }
 0x6e3   : > { %v879_v21 = vpop.f32.mrf.mxu1 }
 0x6e4   : > { %v885_v22 = vmul.f32 0.35355338, %v879_v21  ;;  %v438_v21 = vunpack.c.l.bf16 %v1834_v3  ;;  %v1682_v3 = vld [vmem:[%s2041_s7] sm:$0xff]  }
 0x6e5   : > { %v1598_v23 = vpop.f32.mrf.mxu1 }
 0x6e6   : > { %v886_v24 = vsel %vm510_vm4, %v885_v22, -1e+09 }
 0x6e7   : > { %v882_v25 = vpop.f32.mrf.mxu1  ;;  %v887_v26 = vsel %vm519_vm2, %v886_v24, -inf }
 0x6e8   : > { %888 = vmax.xlane.f32.xlu1 %v887_v26 }
 0x6e9   : > { %v1599_v27 = vpop.f32.mrf.mxu1 }
 0x6f9   : > { %899 = vrot.lane.b32.xlu1 %v1843_v8, %s1730_s17 }
 0x6fd   : > { %997 = vrot.lane.b32.xlu1 %v1843_v8, %s1731_s18 }
 0x701   : > { %995 = vrot.lane.b32.xlu1 %v1843_v8, %s1732_s19  ;;  %s435_s19 = scalar_lea.vmem %s2047_s13, %s1473_s14 }
 0x771   : > { %v889_v28 = vpop.xlane.xlu1 %888 }
 0x772   : > { %v890_v29 = vsub.f32 %v886_v24, %v889_v28 }
 0x774   : > { %v891_v30 = vmul.f32 1.442695, %v890_v29 }
 0x775   : > { %v900_v31 = vpop.permute.xlu1 %899 }
 0x776   : > { %1699 = vpow2.f32 %v891_v30  ;;  %v905_v32 = vsel %vm585_vm3, %v900_v31, 0 }
 0x777   : > { %1601 = vmatpush3.bf16.msra.mxu0 %v905_v32 }
 0x778   : > { %1612 = vmatprep.subr.bf16.mxu0 %v1721_v1 }
 0x779   : > { %v998_v38 = vpop.permute.xlu1 %997 }
 0x77a   : > { %v1003_v40 = vsel %vm519_vm2, %v998_v38, 0  ;;  %v1492_v38 = vld [vmem:[%s2039_s5] ss:$0 sm:$0xff] }
 0x77d   : > { %v996_v41 = vpop.permute.xlu1 %995 }
 0x783   : > { %v1700_v33 = vpop.eup %1699 }
 0x784   : > { %v893_v34 = vsel %vm519_vm2, %v1700_v33, 0.0 }
 0x785   : > { %894 = vadd.xlane.f32.xlu0 %v893_v34 }
 0x80e   : > { %v895_v35 = vpop.xlane.xlu0 %894 }
 0x80f   : > { %1701 = vrcp.f32 %v895_v35 }
 0x81c   : > { %v1702_v36 = vpop.eup %1701 }
 0x81d   : > { %v897_v37 = vmul.f32 %v1702_v36, %v1700_v33  ;;  %v1681_v33 = vld [vmem:[%s2041_s7 + $0x8] sm:$0xff]  }
 0x81f   : > { %v898_v39 = vpack.c.bf16 %v897_v37, %v897_v37 }
 0x821   : > { %1603 = vmatmul.mubr.msk.bf16.vlgmr.msra.gmra.mxu0 %vm519_vm2, %v898_v39 }
 0x822   : > { %1613 = vmatpush3.bf16.xpose.msra.mxu0 %v1003_v40  ;;  %1614 = vmatprep.mubr.msk.bf16.mxu0 %vm1722_vm0, %v1721_v1  ;;  %v1493_v40 = vld [vmem:[%s2040_s6] ss:$0 sm:$0xff] }
 0x823   : > { %1624 = vmatprep.subr.bf16.mxu0 %v1721_v1 }
 0x829   : > { %1615 = vmatmul.mubr.msk.bf16.vlgmr.msra.gmra.mxu0 %vm519_vm2, %v996_v41 }
 0x82a   : > { %1626 = vmatprep.mubr.msk.bf16.mxu0 %vm1722_vm0, %v1721_v1  ;;  %1625 = vmatpush3.bf16.msra.mxu0 %v1112_v2  ;;  %v1498_v2 = vld [vmem:[%s2044_s10] ss:$0 sm:$0xff] }
 0x82b   : > { %1638 = vmatprep.subr.bf16.mxu0 %v1721_v1 }
 0x8e1   : > { %v941_v44 = vpop.f32.mrf.mxu0 }
 0x8e2   : > { %v947_v45 = vpack.c.bf16 %v941_v44, %v941_v44  ;;  %v1683_v44 = vld [vmem:[%s2043_s9 + $0x38] sm:$0xff]  }
 0x8e3   : > { %v1604_v46 = vpop.f32.mrf.mxu0 }
 0x8e4   : > { %1609 = vmatmul.mubr.msk.bf16.vlgmr.msra.gmra.mxu1 %vm519_vm2, %v947_v45  ;;  %v1684_v45 = vld [vmem:[%s2043_s9 + $0x30] sm:$0xff]   ;;  %v1685_v46 = vld [vmem:[%s2043_s9 + $0x28] sm:$0xff]  }
 0x8e5   : > { %v944_v47 = vpop.f32.mrf.mxu0  ;;  %1620 = vmatprep.mubr.msk.bf16.mxu1 %vm1722_vm0, %v1721_v1 }
 0x8e6   : > { %v1686_v47 = vld [vmem:[%s2043_s9 + $0x20] sm:$0xff]  }
 0x8e7   : > { %v1605_v48 = vpop.f32.mrf.mxu0 }
 0x8e8   : > { %v1687_v48 = vld [vmem:[%s2043_s9 + $0x18] sm:$0xff]  }
 0x8e9   : > { %v1039_v49 = vpop.f32.mrf.mxu0 }
 0x8ea   : > { %v1045_v50 = vmul.f32 0.35355338, %v1039_v49  ;;  %v1688_v49 = vld [vmem:[%s2043_s9 + $0x10] sm:$0xff]  }
 0x8eb   : > { %v1616_v51 = vpop.f32.mrf.mxu0 }
 0x8ec   : > { %v1046_v52 = vsel %vm510_vm4, %v1045_v50, -1e+09  ;;  %v1689_v50 = vld [vmem:[%s2043_s9 + $0x8] sm:$0xff]   ;;  %v1690_v51 = vld [vmem:[%s2043_s9] sm:$0xff]  }
 0x8ed   : > { %v1042_v53 = vpop.f32.mrf.mxu0  ;;  %v1047_v54 = vsel %vm519_vm2, %v1046_v52, -inf }
 0x8ee   : > { %1048 = vmax.xlane.f32.xlu1 %v1047_v54 }
 0x8ef   : > { %v1617_v55 = vpop.f32.mrf.mxu0 }
 0x977   : > { %v1049_v56 = vpop.xlane.xlu1 %1048 }
 0x978   : > { %v1050_v57 = vsub.f32 %v1046_v52, %v1049_v56  ;;  %v1494_v52 = vld [vmem:[%s2042_s8] ss:$0 sm:$0xff] }
 0x97a   : > { %v1051_v58 = vmul.f32 1.442695, %v1050_v57 }
 0x97c   : > { %1703 = vpow2.f32 %v1051_v58 }
 0x989   : > { %v1704_v59 = vpop.eup %1703 }
 0x98a   : > { %v1053_v60 = vsel %vm519_vm2, %v1704_v59, 0.0 }
 0x98b   : > { %1054 = vadd.xlane.f32.xlu0 %v1053_v60 }
 0x9a1   : > { %1059 = vrot.lane.b32.xlu0 %v1843_v8, %s1733_s22 }
 0x9a4   : > { %v988_v17 = vpop.f32.mrf.mxu1 }
 0x9a5   : > { %v994_v61 = vadd.f32 %v988_v17, %v830_v16 }
 0x9a6   : > { %v1610_v62 = vpop.f32.mrf.mxu1 }
 0x9a8   : > { %v991_v0 = vpop.f32.mrf.mxu1 }
 0x9aa   : > { %v1611_v4 = vpop.f32.mrf.mxu1 }
 0xa14   : > { %v1055_v5 = vpop.xlane.xlu0 %1054 }
 0xa15   : > { %1705 = vrcp.f32 %v1055_v5 }
 0xa18   : > { %v1060_v8 = vpop.permute.xlu0 %1059 }
 0xa19   : > { %v1065_v6 = vsel %vm585_vm3, %v1060_v8, 0 }
 0xa1a   : > { %1619 = vmatpush3.bf16.msra.mxu1 %v1065_v6 }
 0xa1b   : > { %1630 = vmatprep.subr.bf16.mxu1 %v1721_v1 }
 0xa22   : > { %v1706_v7 = vpop.eup %1705 }
 0xa23   : > { %v1057_v9 = vmul.f32 %v1706_v7, %v1704_v59 }
 0xa25   : > { %v1058_v10 = vpack.c.bf16 %v1057_v9, %v1057_v9 }
 0xa27   : > { %1621 = vmatmul.mubr.msk.bf16.vlgmr.msra.gmra.mxu1 %vm519_vm2, %v1058_v10 }
 0xa28   : > { %1634 = vmatprep.mubr.msk.bf16.mxu1 %vm1722_vm0, %v1721_v1  ;;  %1631 = vmatpush3.bf16.msra.mxu1 %v1681_v33 }
 0xa29   : > { %1632 = vmatprep.subr.bf16.mxu1 %v1721_v1 }
 0xa2c   : > { %1633 = vmatpush3.bf16.msra.mxu1 %v1682_v3 }
 0xae7   : > { %v1101_v11 = vpop.f32.mrf.mxu1 }
 0xae8   : > { %v1107_v12 = vpack.c.bf16 %v1101_v11, %v1101_v11 }
 0xae9   : > { %v1622_v13 = vpop.f32.mrf.mxu1 }
 0xaea   : > { %1627 = vmatmul.mubr.msk.bf16.vlgmr.msra.gmra.mxu0 %vm519_vm2, %v1107_v12 }
 0xaeb   : > { %v1104_v14 = vpop.f32.mrf.mxu1  ;;  %1654 = vmatprep.mubr.msk.bf16.mxu0 %vm1722_vm0, %v1721_v1  ;;  %1639 = vmatpush3.bf16.msra.mxu0 %v1683_v44 }
 0xaec   : > { %1640 = vmatprep.subr.bf16.mxu0 %v1721_v1 }
 0xaed   : > { %v1623_v15 = vpop.f32.mrf.mxu1 }
 0xaef   : > { %1641 = vmatpush3.bf16.msra.mxu0 %v1684_v45 }
 0xaf0   : > { %1642 = vmatprep.subr.bf16.mxu0 %v1721_v1 }
 0xaf3   : > { %1643 = vmatpush3.bf16.msra.mxu0 %v1685_v46 }
 0xaf4   : > { %1644 = vmatprep.subr.bf16.mxu0 %v1721_v1 }
 0xaf7   : > { %1645 = vmatpush3.bf16.msra.mxu0 %v1686_v47 }
 0xaf8   : > { %1646 = vmatprep.subr.bf16.mxu0 %v1721_v1 }
 0xafb   : > { %1647 = vmatpush3.bf16.msra.mxu0 %v1687_v48 }
 0xafc   : > { %1648 = vmatprep.subr.bf16.mxu0 %v1721_v1 }
 0xaff   : > { %1649 = vmatpush3.bf16.msra.mxu0 %v1688_v49 }
 0xb00   : > { %1650 = vmatprep.subr.bf16.mxu0 %v1721_v1 }
 0xb03   : > { %1651 = vmatpush3.bf16.msra.mxu0 %v1689_v50 }
 0xb04   : > { %1652 = vmatprep.subr.bf16.mxu0 %v1721_v1 }
 0xb07   : > { %1653 = vmatpush3.bf16.msra.mxu0 %v1690_v51 }
 0xbaa   : > { %v1148_v18 = vpop.f32.mrf.mxu0 }
 0xbab   : > { %v1154_v20 = vadd.f32 %v1148_v18, %v994_v61 }
 0xbac   : > { %v1628_v22 = vpop.f32.mrf.mxu0 }
 0xbad   : > { %v1162_v23 = vadd.f32 %v1491_v19, %v1154_v20  ;;  %v1507_v22 = vld [vmem:[%s2045_s11] ss:$0 sm:$0xff] }
 0xbae   : > { %v1151_v24 = vpop.f32.mrf.mxu0 }
 0xbaf   : > { %v1163_v25 = vadd.f32 %v1162_v23, %v438_v21  ;;  %v1508_v24 = vld [vmem:[%s2046_s12] ss:$0 sm:$0xff] }
 0xbb0   : > { %v1629_v26 = vpop.f32.mrf.mxu0 }
 0xbb1   : > { %v1166_v27 = vsel %vm462_vm1, %v1163_v25, 0.0 }
 0xbb2   : > { %1167 = vadd.xlane.f32.xlu0 %v1166_v27 }
 0xc3b   : > { %v1168_v28 = vpop.xlane.xlu0 %1167 }
 0xc3c   : > { %v1170_v29 = vmul.f32 0.03125, %v1168_v28 }
 0xc3e   : > { %v1171_v30 = vsub.f32 %v1163_v25, %v1170_v29 }
 0xc40   : > { %v1172_v31 = vmul.f32 %v1171_v30, %v1171_v30 }
 0xc42   : > { %v1173_v32 = vsel %vm462_vm1, %v1172_v31, 0.0 }
 0xc43   : > { %1174 = vadd.xlane.f32.xlu1 %v1173_v32 }
 0xccc   : > { %v1175_v34 = vpop.xlane.xlu1 %1174 }
 0xccd   : > { %v1176_v35 = vmul.f32 0.03125, %v1175_v34 }
 0xccf   : > { %v1177_v36 = vadd.f32 1e-05, %v1176_v35 }
 0xcd1   : > { %1707 = vrsqrt.f32 %v1177_v36 }
 0xcde   : > { %v1708_v37 = vpop.eup %1707 }
 0xcdf   : > { %v1179_v39 = vmul.f32 %v1708_v37, %v1171_v30 }
 0xce1   : > { %v1186_v41 = vmul.f32 %v1492_v38, %v1179_v39 }
 0xce3   : > { %v1193_v42 = vadd.f32 %v1493_v40, %v1186_v41 }
 0xce5   : > { %v1194_v43 = vpack.c.bf16 %v1193_v42, %v1193_v42 }
 0xce7   : > { %1635 = vmatmul.mubr.msk.bf16.vlgmr.msra.gmra.mxu1 %vm462_vm1, %v1194_v43 }
 0xda7   : > { %v1255_v53 = vpop.f32.mrf.mxu1 }
 0xda8   : > { %v1256_v54 = vadd.f32 %v1494_v52, %v1255_v53 }
 0xda9   : > { %v1636_v55 = vpop.f32.mrf.mxu1 }
 0xdaa   : > { %v1262_v56 = vmul.f32 0.044715, %v1256_v54  ;;  %v1261_v62 = vmul.f32 0.5, %v1256_v54 }
 0xdab   : > { %v1258_v57 = vpop.f32.mrf.mxu1 }
 0xdac   : > { %v1263_v58 = vmul.f32 %v1262_v56, %v1256_v54 }
 0xdad   : > { %v1637_v59 = vpop.f32.mrf.mxu1 }
 0xdae   : > { %v1264_v60 = vmul.f32 %v1263_v58, %v1256_v54 }
 0xdb0   : > { %v1265_v16 = vadd.f32 %v1264_v60, %v1256_v54 }
 0xdb2   : > { %v1266_v17 = vmul.f32 0.7978846, %v1265_v16 }
 0xdb4   : > { %1709 = vtanh.f32 %v1266_v17 }
 0xdc1   : > { %v1710_v61 = vpop.eup %1709 }
 0xdc2   : > { %v1268_v63 = vadd.f32 1.0, %v1710_v61 }
 0xdc4   : > { %v1269_v1 = vmul.f32 %v1268_v63, %v1261_v62 }
 0xdc6   : > { %v1270_v0 = vpack.c.bf16 %v1269_v1, %v1269_v1 }
 0xdc8   : > { %1655 = vmatmul.mubr.bf16.vlgmr.msra.gmra.mxu0 %v1270_v0 }
 0xe88   : > { %v1376_v4 = vpop.f32.mrf.mxu0 }
 0xe89   : > { %v1377_v5 = vadd.f32 %v1498_v2, %v1376_v4 }
 0xe8a   : > { %v1656_v8 = vpop.f32.mrf.mxu0 }
 0xe8b   : > { %v1382_v6 = vadd.f32 %v1377_v5, %v1193_v42 }
 0xe8c   : > { %v1379_v7 = vpop.f32.mrf.mxu0 }
 0xe8d   : > { %v1385_v9 = vsel %vm462_vm1, %v1382_v6, 0.0 }
 0xe8e   : > { %1386 = vadd.xlane.f32.xlu1 %v1385_v9  ;;  %v1657_v10 = vpop.f32.mrf.mxu0 }
 0xf17   : > { %v1387_v11 = vpop.xlane.xlu1 %1386 }
 0xf18   : > { %v1388_v12 = vmul.f32 0.03125, %v1387_v11 }
 0xf1a   : > { %v1389_v13 = vsub.f32 %v1382_v6, %v1388_v12 }
 0xf1c   : > { %v1390_v14 = vmul.f32 %v1389_v13, %v1389_v13 }
 0xf1e   : > { %v1391_v15 = vsel %vm462_vm1, %v1390_v14, 0.0 }
 0xf1f   : > { %1392 = vadd.xlane.f32.xlu1 %v1391_v15 }
 0xfa8   : > { %v1393_v18 = vpop.xlane.xlu1 %1392 }
 0xfa9   : > { %v1394_v19 = vmul.f32 0.03125, %v1393_v18 }
 0xfab   : > { %v1395_v20 = vadd.f32 1e-05, %v1394_v19 }
 0xfad   : > { %1711 = vrsqrt.f32 %v1395_v20 }
 0xfba   : > { %v1712_v21 = vpop.eup %1711 }
 0xfbb   : > { %v1397_v23 = vmul.f32 %v1712_v21, %v1389_v13 }
 0xfbd   : > { %v1404_v25 = vmul.f32 %v1507_v22, %v1397_v23 }
 0xfbf   : > { %v1411_v26 = vadd.f32 %v1508_v24, %v1404_v25 }
 0xfc1   : > { %v1412_v27 = vpack.c.bf16 %v1411_v26, %v1411_v26 }
 0xfc3   : > { %1414 = vst.msk [vmem:[%s435_s19] sm:$0xf] %vm1413_vm5, %v1412_v27 }
 0xfc4 PF: > { %s23_s25 = sadd.s32 1, %s1719_s25  }
 0xfc5   : > { %p20_p4 = scmp.ge.s32.totalorder %s23_s25, 4  }
 0xfc7   :  { %22 = sbr.rel (!%p20_p4) target bundleno = 1 (0x1), region = 102 }

</bundles_post_ra>
